<compile_context>
chip_gen: v5e
topology: v5e:2x2
jax: 0.10.0
libtpu: 0.0.40
codegen_flags: <defaults>
</compile_context>

<pallas_src>
import functools
import math

import jax
import jax.numpy as jnp
from jax.experimental import pallas as pl
from jax.experimental.pallas import tpu as pltpu


def _round_up(a, b):
    return -(-a // b) * b


# ---------------------------------------------------------------------------
# Kernel: channel-major, lane-dense chunked stores.
#   out[d, h*W + w] = w1t[d, h] + w2t[d, w]
# ---------------------------------------------------------------------------
def _axial_channel_kernel(w1_ref, w2_ref, o_ref, *, rows_pad, W, rchunk):
    # w1_ref: (ct, rows_pad) f32  axis-1 weights, channel-major (zero-padded in
    #                             concat mode so the plain add is exact)
    # w2_ref: (ct, W)        f32  axis-2 weights, channel-major
    # o_ref : (1, ct, rows_pad*W) output tile; lane dim is a multiple of 128
    w2 = w2_ref[...]                                        # (ct, W)
    chunk_w = rchunk * W                                    # multiple of 128
    for k in range(rows_pad // rchunk):                     # small static unroll
        r0 = k * rchunk
        w1c = w1_ref[:, r0:r0 + rchunk]                     # (ct, rchunk)
        seg = w1c[:, :, None] + w2[:, None, :]              # (ct, rchunk, W)
        o_ref[0, :, r0 * W:r0 * W + chunk_w] = (
            seg.reshape(seg.shape[0], chunk_w).astype(o_ref.dtype))


# ---------------------------------------------------------------------------
# Image-level wrapper == AxialPositionalEmbeddingImage.forward(img)
# ---------------------------------------------------------------------------
def axial_positional_embedding_image(img, weights, axial_shape, summed,
                                     *, target_block_bytes=4 * 1024 * 1024):
    b, c, h, w = img.shape
    H, W = (int(s) for s in axial_shape)
    t = h * w
    assert t <= H * W, "sequence length exceeds max_seq_len"

    out_dtype = jnp.dtype(img.dtype)
    itemsize = out_dtype.itemsize
    pack = max(8, 32 // itemsize)            # sublane packing of output dtype

    # ---- parameter-scale prep: channel-major (transposed) axial weights -----
    w1 = weights[0].reshape(H, weights[0].shape[-1]).astype(jnp.float32)  # (H, d1)
    w2 = weights[1].reshape(W, weights[1].shape[-1]).astype(jnp.float32)  # (W, d2)
    d1, d2 = int(w1.shape[-1]), int(w2.shape[-1])
    if summed:
        assert d1 == d2 == c, "summed mode requires equal axial dims == channels"
        dt = d1
        w1t, w2t = w1.T, w2.T                               # (dt, H), (dt, W)
    else:
        dt = d1 + d2
        assert dt == c, "axial dims must sum to the channel dim"
        w1t = jnp.pad(w1.T, ((0, d2), (0, 0)))              # channels [0, d1)
        w2t = jnp.pad(w2.T, ((d1, 0), (0, 0)))              # channels [d1, dt)

    # ---- sequence tiling: whole axial rows, chunk width a multiple of 128 ---
    rows_cov = -(-t // W)                                   # rows covering t
    rchunk = 128 // math.gcd(W, 128)                        # lane-dense chunk rows
    while -(-rows_cov // rchunk) > 16 and rchunk * 2 * W <= 2048:
        rchunk *= 2                                         # fewer, wider stores
    rows_pad = _round_up(rows_cov, rchunk)
    t_pad = rows_pad * W                                    # multiple of 128

    if rows_pad <= H:
        w1t = w1t[:, :rows_pad]
    else:
        w1t = jnp.pad(w1t, ((0, 0), (0, rows_pad - H)))

    # ---- channel tiling: block <= target bytes, grid >= 2 when possible -----
    dt_pad = _round_up(dt, pack)
    ct = max(pack, (target_block_bytes // (t_pad * itemsize)) // pack * pack)
    ct = min(ct, _round_up(min(dt_pad, 256), pack))         # keep in-kernel temps small
    ct = min(ct, dt_pad)
    if b * (-(-dt_pad // ct)) < 2 and dt_pad >= 2 * pack:
        ct = _round_up(dt_pad // 2, pack)                   # let both v7x TCs work
    n_ct = -(-dt_pad // ct)
    dt_final = n_ct * ct
    if dt_final > dt:
        w1t = jnp.pad(w1t, ((0, dt_final - dt), (0, 0)))
        w2t = jnp.pad(w2t, ((0, dt_final - dt), (0, 0)))

    kernel = functools.partial(_axial_channel_kernel,
                               rows_pad=rows_pad, W=W, rchunk=rchunk)
    pos = pl.pallas_call(
        kernel,
        out_shape=jax.ShapeDtypeStruct((b, dt_final, t_pad), out_dtype),
        grid_spec=pltpu.PrefetchScalarGridSpec(
            num_scalar_prefetch=0,
            grid=(n_ct, b),                                 # batch innermost: weight
            in_specs=[                                      # blocks reused, no refetch
                pl.BlockSpec((ct, rows_pad), lambda ci, bi: (ci, 0)),
                pl.BlockSpec((ct, W), lambda ci, bi: (ci, 0)),
            ],
            out_specs=pl.BlockSpec((1, ct, t_pad), lambda ci, bi: (bi, ci, 0)),
        ),
        compiler_params=pltpu.CompilerParams(
            dimension_semantics=("parallel", "parallel"),
            # <=4 MiB blocks double-buffered stay well inside the 32 MiB scoped
            # limit, which is safe on v5e/v6e (128 MiB phys) and v7x (64 MiB)
            vmem_limit_bytes=32 * 1024 * 1024,
        ),
    )(w1t, w2t)

    # trim only if padding was introduced; the common image path is a pure
    # minor-dim-split reshape (no transpose, no relayout chain)
    if dt_final != c:
        pos = pos[:, :c]
    if t_pad != t:
        pos = pos[:, :, :t]
    return pos.reshape(b, c, h, w)


# ---------------------------------------------------------------------------
# Deterministic parameter construction (mirrors PyTorch __init__ shapes)
# ---------------------------------------------------------------------------
def make_axial_weights(key, dim, axial_shape, axial_dims=None):
    summed = axial_dims is None
    if summed:
        axial_dims = (dim,) * len(axial_shape)
    assert len(axial_shape) == len(axial_dims)
    assert summed or sum(axial_dims) == dim
    weights = []
    for ind, (shape, axial_dim) in enumerate(zip(axial_shape, axial_dims)):
        ax_shape = [1] * len(axial_shape)
        ax_shape[ind] = shape
        ax_shape = (1, *ax_shape, axial_dim)
        key, sub = jax.random.split(key)
        weights.append(jax.random.normal(sub, ax_shape, dtype=jnp.float32))
    return weights, summed


# ---------------------------------------------------------------------------
# Pure-JAX reference (mirrors the PyTorch module) for validation
# ---------------------------------------------------------------------------
def _reference_image(img, weights, axial_shape, summed):
    b, c, h, w = img.shape
    t = h * w
    Hax, Wax = axial_shape
    embs = []
    for wt in weights:
        d = wt.shape[-1]
        emb = jnp.broadcast_to(wt, (b, Hax, Wax, d)).reshape(b, Hax * Wax, d)
        embs.append(emb)
    pos = sum(embs) if summed else jnp.concatenate(embs, axis=-1)
    pos = pos[:, :t].astype(img.dtype)
    return jnp.transpose(pos.reshape(b, h, w, c), (0, 3, 1, 2))


if __name__ == "__main__":
    key = jax.random.PRNGKey(0)
    b, dim = 2, 32
    kimg, kw1, kw2, kw3 = jax.random.split(key, 4)

    # --- case 1: summed path, axial_shape == (h, w) = (16, 16), f32 ----------
    axial_shape = (16, 16)
    img = jax.random.normal(kimg, (b, dim, 16, 16), dtype=jnp.float32)
    weights, summed = make_axial_weights(kw1, dim, axial_shape, None)
    out = axial_positional_embedding_image(img, weights, axial_shape, summed)
    jax.block_until_ready(out)
    ref = _reference_image(img, weights, axial_shape, summed)
    assert out.shape == img.shape, out.shape
    assert jnp.allclose(out, ref, atol=1e-5), "summed path mismatch"

    # --- case 2: concat path (axial_dims sums to dim) -------------------------
    weights2, summed2 = make_axial_weights(kw2, dim, axial_shape, (16, 16))
    out2 = axial_positional_embedding_image(img, weights2, axial_shape, summed2)
    jax.block_until_ready(out2)
    ref2 = _reference_image(img, weights2, axial_shape, summed2)
    assert jnp.allclose(out2, ref2, atol=1e-5), "concat path mismatch"

    # --- case 3: t < max_seq_len (image smaller than the axial grid) ----------
    img3 = jax.random.normal(kimg, (b, dim, 8, 16), dtype=jnp.float32)
    out3 = axial_positional_embedding_image(img3, weights, axial_shape, summed)
    jax.block_until_ready(out3)
    ref3 = _reference_image(img3, weights, axial_shape, summed)
    assert jnp.allclose(out3, ref3, atol=1e-5), "partial-seq path mismatch"

    # --- case 4: multi channel-tile grid (forced small blocks), dim=64 --------
    dim4 = 64
    img4 = jax.random.normal(kimg, (b, dim4, 16, 16), dtype=jnp.float32)
    weights4, summed4 = make_axial_weights(kw3, dim4, axial_shape, None)
    out4 = axial_positional_embedding_image(img4, weights4, axial_shape, summed4,
                                            target_block_bytes=8 * 1024)
    jax.block_until_ready(out4)
    ref4 = _reference_image(img4, weights4, axial_shape, summed4)
    assert jnp.allclose(out4, ref4, atol=1e-5), "multi-block path mismatch"

    # --- case 5: bf16 image dtype (cast at store, pack=16 channel tiles) ------
    img5 = img.astype(jnp.bfloat16)
    out5 = axial_positional_embedding_image(img5, weights, axial_shape, summed)
    jax.block_until_ready(out5)
    ref5 = _reference_image(img5, weights, axial_shape, summed)
    assert jnp.allclose(out5.astype(jnp.float32), ref5.astype(jnp.float32),
                        atol=2e-2), "bf16 path mismatch"

    print("KERNEL_OK")
</pallas_src>

<mosaic_0001>
module attributes {stable_mosaic.version = 11 : i64} {
  func.func @_axial_channel_kernel(%arg0: i32, %arg1: i32, %arg2: memref<32x16xf32, #tpu.memory_space<vmem>>, %arg3: memref<32x16xf32, #tpu.memory_space<vmem>>, %arg4: memref<1x32x256xf32, #tpu.memory_space<vmem>>) attributes {dimension_semantics = [#tpu.dimension_semantics<parallel>, #tpu.dimension_semantics<parallel>], iteration_bounds = array<i64: 1, 2>, scalar_prefetch = 0 : i64, scratch_operands = 0 : i64, tpu.core_type = #tpu.core_type<tc>, window_params = [{transform_indices = @transform_0, window_bounds = array<i64: 32, 16>}, {transform_indices = @transform_1, window_bounds = array<i64: 32, 16>}, {transform_indices = @transform_2, window_bounds = array<i64: 1, 32, 256>}]} {
    %c0 = arith.constant 0 : index
    %c0_0 = arith.constant 0 : index
    %0 = vector.load %arg3[%c0, %c0_0] : memref<32x16xf32, #tpu.memory_space<vmem>>, vector<32x16xf32>
    %c0_1 = arith.constant 0 : index
    %c0_2 = arith.constant 0 : index
    %1 = vector.load %arg2[%c0_1, %c0_2] : memref<32x16xf32, #tpu.memory_space<vmem>>, vector<32x8xf32>
    %2 = vector.shape_cast %1 : vector<32x8xf32> to vector<32x8x1xf32>
    %3 = vector.shape_cast %0 : vector<32x16xf32> to vector<32x1x16xf32>
    %4 = vector.broadcast %2 : vector<32x8x1xf32> to vector<32x8x16xf32>
    %5 = vector.broadcast %3 : vector<32x1x16xf32> to vector<32x8x16xf32>
    %6 = arith.addf %4, %5 : vector<32x8x16xf32>
    %7 = vector.shape_cast %6 : vector<32x8x16xf32> to vector<32x128xf32>
    %c0_3 = arith.constant 0 : index
    %c0_4 = arith.constant 0 : index
    %c0_5 = arith.constant 0 : index
    %8 = vector.load %arg4[%c0_3, %c0_4, %c0_5] : memref<1x32x256xf32, #tpu.memory_space<vmem>>, vector<1x32x128xf32>
    %9 = vector.shape_cast %8 : vector<1x32x128xf32> to vector<32x128xf32>
    %10 = vector.shape_cast %7 : vector<32x128xf32> to vector<1x32x128xf32>
    tpu.vector_store %arg4[%c0_3, %c0_4, %c0_5], %10 {strides = array<i32>} : memref<1x32x256xf32, #tpu.memory_space<vmem>>, vector<1x32x128xf32>,
    %c0_6 = arith.constant 0 : index
    %c8 = arith.constant 8 : index
    %11 = vector.load %arg2[%c0_6, %c8] : memref<32x16xf32, #tpu.memory_space<vmem>>, vector<32x8xf32>
    %12 = vector.shape_cast %11 : vector<32x8xf32> to vector<32x8x1xf32>
    %13 = vector.shape_cast %0 : vector<32x16xf32> to vector<32x1x16xf32>
    %14 = vector.broadcast %12 : vector<32x8x1xf32> to vector<32x8x16xf32>
    %15 = vector.broadcast %13 : vector<32x1x16xf32> to vector<32x8x16xf32>
    %16 = arith.addf %14, %15 : vector<32x8x16xf32>
    %17 = vector.shape_cast %16 : vector<32x8x16xf32> to vector<32x128xf32>
    %c0_7 = arith.constant 0 : index
    %c0_8 = arith.constant 0 : index
    %c128 = arith.constant 128 : index
    %18 = vector.load %arg4[%c0_7, %c0_8, %c128] : memref<1x32x256xf32, #tpu.memory_space<vmem>>, vector<1x32x128xf32>
    %19 = vector.shape_cast %18 : vector<1x32x128xf32> to vector<32x128xf32>
    %20 = vector.shape_cast %17 : vector<32x128xf32> to vector<1x32x128xf32>
    tpu.vector_store %arg4[%c0_7, %c0_8, %c128], %20 {strides = array<i32>} : memref<1x32x256xf32, #tpu.memory_space<vmem>>, vector<1x32x128xf32>,
    return
  }
  func.func @transform_0(%arg0: i32, %arg1: i32) -> (i32, i32) {
    %c0_i32 = arith.constant 0 : i32
    %c0_i32_0 = arith.constant 0 : i32
    return %arg0, %c0_i32 : i32, i32
  }
  func.func @transform_1(%arg0: i32, %arg1: i32) -> (i32, i32) {
    %c0_i32 = arith.constant 0 : i32
    %c0_i32_0 = arith.constant 0 : i32
    return %arg0, %c0_i32 : i32, i32
  }
  func.func @transform_2(%arg0: i32, %arg1: i32) -> (i32, i32, i32) {
    %c0_i32 = arith.constant 0 : i32
    %c0_i32_0 = arith.constant 0 : i32
    return %arg1, %arg0, %c0_i32 : i32, i32, i32
  }
}

</mosaic_0001>

<bundles_post_ra>
// kernel: tpu_custom_call.1
= control target key start
LH: loop header
LB: loop body
LE: loop exit
PB: predicated region body
PF: predicated region fallthrough
CT: control target
= control target key end

     0   :  { %7 = vsyncpa [#allocation3], 0  ;;  %s3634_s0 = inlined_call_operand.vmem [shape: f32[32,16], index: 0, kind: input, shape index: {}]   ;;  %s3635_s1 = inlined_call_operand.vmem [shape: f32[32,16], index: 1, kind: input, shape index: {}]   ;;  %s3636_s2 = inlined_call_operand.hbm [shape: f32[2,32,256], index: 2, kind: output, shape index: {}]  }
   0x1   :  { %9 = vsyncpa [#allocation3 + $0x1], 0  ;;  %s2295_s9 = smov 0   ;;  %s2297_s10 = smov 0  }
   0x2   :  { %s2299_s11 = smov 0   ;;  %s2301_s12 = smov 0  }
   0x3   :  { %s2303_s13 = smov 0   ;;  %s2305_s14 = smov 0  }
   0x4 LB: > { %s2103_s15 = sadd.s32 4294967295, %s2268_s14   ;;  %s2104_s16 = sadd.s32 4294967294, %s2268_s14   ;;  %s2268_s14 = sphi %s2305_s14, %s15_s14   ;;  %s2264_s13 = sphi %s2303_s13, %s3782_s13   ;;  %s2260_s12 = sphi %s2301_s12, %s3781_s12   ;;  %s2256_s11 = sphi %s2299_s11, %s3780_s11   ;;  %s2252_s10 = sphi %s2297_s10, %s3779_s10   ;;  %s2248_s9 = sphi %s2295_s9, %s3778_s9  }
   0x5   : > { %s24_s17 = sadd.s32 1, %s2264_s13  ;;  %s88_s18 = sadd.s32 1, %s2256_s11 }
   0x6   : > { %p25_p0 = scmp.ge.s32.totalorder %s24_s17, 2  ;;  %p98_p1 = scmp.ne.s32.totalorder %s2256_s11, %s2252_s10 }
   0x7   : > { %p99_p2 = scmp.eq.s32.totalorder %s2103_s15, 1  ;;  %p104_p3 = scmp.ne.s32.totalorder %s2252_s10, %s2248_s9 }
   0x8   : > { %s3784_s17 = smov (%p25_p0, %s24_s17), 0  ;;  %p105_p5 = scmp.eq.s32.totalorder %s2104_s16, 1 }
   0x9   : > { %p2335_p4 = por %p99_p2, %p98_p1  ;;  %s83_s20 = ssub.s32 %s2264_s13, %s3784_s17 }
   0xa   : > { %p2108_p6 = scmp.ge.s32.totalorder %s2268_s14, 1  ;;  %p86_p7 = scmp.eq.s32.totalorder %s83_s20, 0 }
   0xb   : > { %p2342_p8 = por %p105_p5, %p104_p3  ;;  %p141_p9 = scmp.lt.s32.totalorder %s2268_s14, 3 }
   0xc   : > { %s2348_s22 = scalar_select %p86_p7, %s2256_s11, %s88_s18  }
   0xd   : > { %p142_p10 = pnand %p2108_p6, %p141_p9 }
   0xf   : > { %145 = sbr.rel (%p142_p10) target bundleno = 681 (0x2a9), region = 28 }
  0x14   : > { %v190_v0 = vlaneseq  ;;  %v2358_v2 = vld [vmem:[%s3634_s0] sm:$0xff]  ;;  %v2381_v9 = vld [vmem:[%s3634_s0 + $0x8] sm:$0xff]  ;;  %v2411_v19 = vld [vmem:[%s3634_s0 + $0x10] sm:$0xff]  ;;  %vm542_vm0 = vcmask 1047556   ;;  %v2270_v52 = vmov 1983009808  }
  0x15   : > { %v3658_v3 = vperm.slane %v2358_v2, 4  ;;  %v3661_v4 = vperm.slane %v2358_v2, 2  ;;  %v3664_v5 = vperm.slane %v2358_v2, 0  ;;  %v3662_v6 = vperm.slane %v2358_v2, 5  ;;  %v2441_v29 = vld [vmem:[%s3634_s0 + $0x18] sm:$0xff]  ;;  %v2467_v41 = vld [vmem:[%s3635_s1] sm:$0xff] }
  0x16   : > { %v2350_v1 = vshrl.u32 %v190_v0, 7  ;;  %v3665_v7 = vperm.slane %v2358_v2, 3  ;;  %v3666_v8 = vperm.slane %v2358_v2, 1  ;;  %v3659_v10 = vperm.slane %v2381_v9, 0  ;;  %s2272_s7 = smov 16   ;;  %s2273_s20 = smov 32  }
  0x17   : > { %v3654_v11 = vperm.slane %v2358_v2, 7  ;;  %v3663_v12 = vperm.slane %v2358_v2, 6  ;;  %v3656_v13 = vperm.slane %v2381_v9, 3  ;;  %v3651_v14 = vperm.slane %v2381_v9, 2  ;;  %s2274_s23 = smov 48   ;;  %s2275_s24 = smov 64  }
  0x18   : > { %2183 = vset.pattern.permute.xlu2 %v2350_v1  ;;  %2182 = vset.pattern.permute.xlu1 %v2350_v1  ;;  %v3660_v15 = vperm.slane %v2381_v9, 1  ;;  %v3652_v16 = vperm.slane %v2381_v9, 6  ;;  %v280_v17 = vperm.slane %v2381_v9, 5  ;;  %v3657_v18 = vperm.slane %v2381_v9, 4  ;;  %s2276_s25 = smov 80   ;;  %s2277_s26 = smov 96  }
  0x19   : > { %2181 = vset.pattern.permute.xlu0 %v2350_v1  ;;  %v3649_v20 = vperm.slane %v2411_v19, 1  ;;  %v3646_v21 = vperm.slane %v2411_v19, 0  ;;  %v3653_v22 = vperm.slane %v2381_v9, 7  ;;  %v3647_v23 = vperm.slane %v2411_v19, 4  ;;  %s2278_s27 = smov 112   ;;  %s165_s4 = sand.u32 1, %s2252_s10  }
  0x1a   : > { %v3643_v24 = vperm.slane %v2411_v19, 3  ;;  %v3650_v25 = vperm.slane %v2411_v19, 2  ;;  %v3644_v26 = vperm.slane %v2411_v19, 7  ;;  %v343_v27 = vperm.slane %v2411_v19, 6  ;;  %s2109_s8 = sshll.u32 %s165_s4, 6  ;;  %s2115_s16 = sshll.u32 %s2260_s12, 6 }
  0x1b   : > { %v3648_v28 = vperm.slane %v2411_v19, 5  ;;  %v3641_v30 = vperm.slane %v2441_v29, 2  ;;  %v3638_v31 = vperm.slane %v2441_v29, 1  ;;  %v3645_v32 = vperm.slane %v2441_v29, 0  ;;  %s3110_s15 = scalar_lea.vmem [#allocation2], %s2109_s8  ;;  %s2210_s30 = scalar_lea.hbm %s3636_s2, 128 }
  0x1c   : > { %v3639_v33 = vperm.slane %v2441_v29, 5  ;;  %v385_v34 = vperm.slane %v2441_v29, 4  ;;  %v3642_v35 = vperm.slane %v2441_v29, 3  ;;  %v406_v36 = vperm.slane %v2441_v29, 7 }
  0x1d   : > { %v3640_v37 = vperm.slane %v2441_v29, 6  ;;  %v1148_v38 = vadd.s32 8, %v2350_v1  ;;  %v418_v42 = vrot.slane %v2467_v41, 2  ;;  %v3637_v43 = vperm.slane %v2467_v41, 0 }
  0x1e   : > { %v419_v48 = vrot.slane %v2467_v41, 3  ;;  %v417_v50 = vrot.slane %v2467_v41, 1  ;;  %v547_v53 = vunpack.c.l.s4 %v2270_v52  ;;  %v420_v55 = vrot.slane %v2467_v41, 4 }
  0x1f   : > { %v2471_v45 = vperm.slane %v418_v42, 0  ;;  %v421_v56 = vrot.slane %v2467_v41, 5  ;;  %vm1102_vm1 = vcmask 130048   ;;  %vm1107_vm2 = vcmask 261120  }
  0x20   : > { %222 = vperm.xlu2 %2183, %v3658_v3   ;;  %208 = vperm.xlu1 %2182, %v3661_v4   ;;  %v2482_v57 = vperm.slane %v419_v48, 0  ;;  %v2485_v59 = vperm.slane %v417_v50, 0  ;;  %v2487_v60 = vunpack.c.0.s8 %v547_v53  ;;  %v2489_v62 = vperm.slane %v420_v55, 0 }
  0x21   : > { %194 = vperm.xlu0 %2181, %v3664_v5   ;;  %v2491_v63 = vperm.slane %v421_v56, 0  ;;  %vm1112_vm3 = vcmask 392192   ;;  %vm1117_vm4 = vcmask 523264   ;;  %vm1122_vm5 = vcmask 654336  }
  0x22   : > { %3695 = vst [vmem:[#allocation5_spill] sm:$0xff] %v2489_v62  ;;  %vm1132_vm6 = vcmask 916480   ;;  %vm1127_vm7 = vcmask 785408  }
  0x23   : > { %3696 = vst [vmem:[#allocation6_spill] sm:$0xff] %v2491_v63 }
  0x28   : > { %229 = vperm.xlu2 %2183, %v3662_v6   ;;  %215 = vperm.xlu1 %2182, %v3665_v7  }
  0x29   : > { %201 = vperm.xlu0 %2181, %v3666_v8  }
  0x30   : > { %250 = vperm.xlu2 %2183, %v3659_v10   ;;  %243 = vperm.xlu1 %2182, %v3654_v11  }
  0x31   : > { %236 = vperm.xlu0 %2181, %v3663_v12  }
  0x38   : > { %271 = vperm.xlu2 %2183, %v3656_v13   ;;  %264 = vperm.xlu1 %2182, %v3651_v14  }
  0x39   : > { %257 = vperm.xlu0 %2181, %v3660_v15  }
  0x40   : > { %292 = vperm.xlu2 %2183, %v3652_v16   ;;  %285 = vperm.xlu1 %2182, %v280_v17   ;;  %v423_v17 = vrot.slane %v2467_v41, 7 }
  0x41   : > { %278 = vperm.xlu0 %2181, %v3657_v18  }
  0x42   : > { %v2501_v53 = vperm.slane %v423_v17, 0 }
  0x44   : > { %3697 = vst [vmem:[#allocation7_spill] sm:$0xff] %v2501_v53 }
  0x48   : > { %313 = vperm.xlu2 %2183, %v3649_v20   ;;  %306 = vperm.xlu1 %2182, %v3646_v21  }
  0x49   : > { %299 = vperm.xlu0 %2181, %v3653_v22  }
  0x50   : > { %334 = vperm.xlu2 %2183, %v3647_v23   ;;  %327 = vperm.xlu1 %2182, %v3643_v24  }
  0x51   : > { %320 = vperm.xlu0 %2181, %v3650_v25  }
  0x58   : > { %355 = vperm.xlu2 %2183, %v3644_v26   ;;  %348 = vperm.xlu1 %2182, %v343_v27  }
  0x59   : > { %341 = vperm.xlu0 %2181, %v3648_v28  }
  0x60   : > { %376 = vperm.xlu2 %2183, %v3641_v30   ;;  %369 = vperm.xlu1 %2182, %v3638_v31  }
  0x61   : > { %362 = vperm.xlu0 %2181, %v3645_v32  }
  0x68   : > { %397 = vperm.xlu2 %2183, %v3639_v33   ;;  %390 = vperm.xlu1 %2182, %v385_v34   ;;  %v422_v34 = vrot.slane %v2467_v41, 6 }
  0x69   : > { %383 = vperm.xlu0 %2181, %v3642_v35  }
  0x6a   : > { %v2507_v56 = vperm.slane %v422_v34, 0  ;;  %v2516_v34 = vld [vmem:[%s3635_s1 + $0x8] sm:$0xff] }
  0x6b   : > { %3699 = vst [vmem:[#allocation9_spill] sm:$0xff] %v2516_v34  ;;  %v426_v30 = vrot.slane %v2516_v34, 3 }
  0x6c   : > { %3698 = vst [vmem:[#allocation8_spill] sm:$0xff] %v2507_v56 }
  0x70   : > { %411 = vperm.xlu1 %2182, %v406_v36   ;;  %2186 = vset.pattern.permute.xlu2 %v1148_v38 }
  0x71   : > { %404 = vperm.xlu0 %2181, %v3640_v37  }
  0x78   : > { %2185 = vset.pattern.permute.xlu1 %v1148_v38 }
  0x79   : > { %2184 = vset.pattern.permute.xlu0 %v1148_v38 }
  0x7a   : > { %v223_v39 = vpop.permute.xlu2 %222 }
  0x7b   : > { %v513_v48 = vadd.f32 %v2489_v62, %v223_v39 }
  0x82   : > { %v230_v40 = vpop.permute.xlu2 %229 }
  0x83   : > { %v514_v50 = vadd.f32 %v2491_v63, %v230_v40  ;;  %v568_v40 = vrot.slane %v513_v48, 4 }
  0x8a   : > { %v2473_v46 = vpop.permute.xlu2 %250 }
  0x92   : > { %v209_v44 = vpop.permute.xlu1 %208  ;;  %v272_v36 = vpop.permute.xlu2 %271 }
  0x93   : > { %v195_v47 = vpop.permute.xlu0 %194  ;;  %v511_v51 = vadd.f32 %v2471_v45, %v209_v44 }
  0x94   : > { %v509_v49 = vadd.f32 %v3637_v43, %v195_v47  ;;  %v580_v43 = vrot.slane %v514_v50, 4 }
  0x95   : > { %v541_v38 = vrot.slane %v511_v51, 4 }
  0x96   : > { %v544_v54 = vrot.slane %v509_v49, 4 }
  0x98   : > { %v545_v58 = vsel %vm542_vm0, %v511_v51, %v544_v54  ;;  %v543_v51 = vsel %vm542_vm0, %v541_v38, %v509_v49 }
  0x99   : > { %v553_v44 = vperm.slane %v545_v58, %v2487_v60  ;;  %v2519_v49 = vperm.slane %v543_v51, %v2487_v60 }
  0x9a   : > { %v216_v61 = vpop.permute.xlu1 %215  ;;  %v293_v51 = vpop.permute.xlu2 %292 }
  0x9b   : > { %v512_v0 = vadd.f32 %v2482_v57, %v216_v61  ;;  %v202_v1 = vpop.permute.xlu0 %201  ;;  %v604_v61 = vrot.slane %v553_v44, 4 }
  0x9c   : > { %v510_v27 = vadd.f32 %v2485_v59, %v202_v1 }
  0x9d   : > { %v554_v42 = vrot.slane %v512_v0, 4 }
  0x9e   : > { %v556_v47 = vrot.slane %v510_v27, 4 }
  0x9f   : > { %v555_v52 = vsel %vm542_vm0, %v554_v42, %v510_v27  ;;  %v2271_v42 = vmov 1934713408  }
  0xa0   : > { %v557_v54 = vsel %vm542_vm0, %v512_v0, %v556_v47  ;;  %v2505_v55 = vperm.slane %v555_v52, %v2487_v60  ;;  %v595_v0 = vunpack.c.l.s4 %v2271_v42 }
  0xa1   : > { %v565_v58 = vperm.slane %v557_v54, %v2487_v60 }
  0xa2   : > { %v590_v39 = vrot.slane %v2505_v55, 4  ;;  %v244_v1 = vpop.permute.xlu1 %243  ;;  %v2531_v24 = vunpack.c.0.s8 %v595_v0 }
  0xa3   : > { %v516_v17 = vadd.f32 %v2501_v53, %v244_v1  ;;  %v237_v27 = vpop.permute.xlu0 %236  ;;  %v602_v38 = vrot.slane %v565_v58, 4  ;;  %v605_v52 = vsel %vm542_vm0, %v565_v58, %v604_v61 }
  0xa4   : > { %v515_v47 = vadd.f32 %v2507_v56, %v237_v27  ;;  %v591_v37 = vsel %vm542_vm0, %v590_v39, %v2519_v49  ;;  %v425_v39 = vrot.slane %v2516_v34, 2  ;;  %v613_v25 = vperm.slane %v605_v52, %v2531_v24 }
  0xa5   : > { %v578_v54 = vrot.slane %v516_v17, 4  ;;  %v581_v31 = vsel %vm542_vm0, %v516_v17, %v580_v43  ;;  %v603_v61 = vsel %vm542_vm0, %v602_v38, %v553_v44  ;;  %v424_v17 = vrot.slane %v2516_v34, 1 }
  0xa6   : > { %v589_v1 = vperm.slane %v581_v31, %v2487_v60  ;;  %v566_v33 = vrot.slane %v515_v47, 4  ;;  %v569_v42 = vsel %vm542_vm0, %v515_v47, %v568_v40  ;;  %v597_v47 = vperm.slane %v591_v37, %v2531_v24 }
  0xa7   : > { %v579_v35 = vsel %vm542_vm0, %v578_v54, %v514_v50  ;;  %v577_v27 = vperm.slane %v569_v42, %v2487_v60  ;;  %v2546_v42 = vperm.slane %v426_v30, 0  ;;  %v2551_v38 = vperm.slane %v425_v39, 0  ;;  %v2561_v30 = vpop.permute.xlu2 %313 }
  0xa8   : > { %v2534_v58 = vperm.slane %v579_v35, %v2487_v60  ;;  %v626_v43 = vrot.slane %v589_v1, 4  ;;  %v567_v31 = vsel %vm542_vm0, %v566_v33, %v513_v48  ;;  %v2553_v26 = vperm.slane %v424_v17, 0 }
  0xa9   : > { %v628_v40 = vrot.slane %v577_v27, 4  ;;  %v2543_v0 = vperm.slane %v567_v31, %v2487_v60  ;;  %3700 = vst [vmem:[#allocation10_spill] sm:$0xff] %v2546_v42  ;;  %v640_v32 = vrot.slane %v597_v47, 4  ;;  %v2557_v31 = vadd.f32 %v2546_v42, %v272_v36 }
  0xaa   : > { %v614_v50 = vrot.slane %v2534_v58, 4  ;;  %v265_v54 = vpop.permute.xlu1 %264  ;;  %v627_v35 = vsel %vm542_vm0, %v626_v43, %v577_v27  ;;  %3701 = vst [vmem:[#allocation11_spill] sm:$0xff] %v2551_v38  ;;  %v429_v39 = vrot.slane %v2516_v34, 6  ;;  %v609_v21 = vperm.slane %v603_v61, %v2531_v24 }
  0xab   : > { %v258_v33 = vpop.permute.xlu0 %257  ;;  %v629_v48 = vsel %vm542_vm0, %v589_v1, %v628_v40  ;;  %3702 = vst [vmem:[#allocation12_spill] sm:$0xff] %v2553_v26  ;;  %v2564_v43 = vadd.f32 %v2551_v38, %v265_v54  ;;  %v3655_v40 = vperm.slane %v2516_v34, 0  ;;  %v666_v36 = vrot.slane %v2557_v31, 4 }
  0xac   : > { %v615_v44 = vsel %vm542_vm0, %v614_v50, %v2543_v0  ;;  %v2567_v1 = vadd.f32 %v2553_v26, %v258_v33  ;;  %v430_v54 = vrot.slane %v2516_v34, 7  ;;  %v2585_v20 = vperm.slane %v429_v39, 0 }
  0xad   : > { %v621_v37 = vperm.slane %v615_v44, %v2531_v24  ;;  %v633_v44 = vperm.slane %v627_v35, %v2531_v24  ;;  %v654_v33 = vrot.slane %v2564_v43, 4  ;;  %v2583_v28 = vadd.f32 %v3655_v40, %v2473_v46 }
  0xae   : > { %v667_v23 = vsel %vm542_vm0, %v666_v36, %v2567_v1  ;;  %3703 = vst [vmem:[#allocation13_spill] sm:$0xff] %v2585_v20  ;;  %v428_v35 = vrot.slane %v2516_v34, 5  ;;  %v2594_v36 = vperm.slane %v430_v54, 0  ;;  %v648_v11 = vrot.slane %v609_v21, 4 }
  0xaf   : > { %v641_v27 = vsel %vm542_vm0, %v621_v37, %v640_v32  ;;  %v637_v32 = vperm.slane %v629_v48, %v2531_v24  ;;  %v638_v48 = vrot.slane %v621_v37, 4  ;;  %v646_v16 = vrot.slane %v633_v44, 4 }
  0xb0   : > { %994 = vrot.lane.b32.xlu2 %v641_v27, %s2272_s7  ;;  %v427_v27 = vrot.slane %v2516_v34, 4  ;;  %v2590_v61 = vperm.slane %v667_v23, %v2487_v60  ;;  %3705 = vst [vmem:[#allocation15_spill] sm:$0xff] %v2594_v36  ;;  %v655_v46 = vsel %vm542_vm0, %v654_v33, %v2583_v28  ;;  %v2605_v52 = vadd.f32 %v2585_v20, %v293_v51  ;;  %v2610_v23 = vld [vmem:[%s3635_s1 + $0x10] sm:$0xff]  ;;  %v2617_v33 = vpop.permute.xlu2 %334 }
  0xb1   : > { %v650_v14 = vrot.slane %v637_v32, 4  ;;  %v2602_v37 = vsel %vm542_vm0, %v646_v16, %v609_v21  ;;  %3706 = vst [vmem:[#allocation16_spill] sm:$0xff] %v2610_v23  ;;  %v2615_v40 = vsel %vm542_vm0, %v633_v44, %v648_v11  ;;  %v433_v16 = vrot.slane %v2610_v23, 3 }
  0xb2   : > { %v286_v17 = vpop.permute.xlu1 %285  ;;  %v2592_v22 = vperm.slane %v427_v27, 0  ;;  %v2612_v27 = vperm.slane %v428_v35, 0  ;;  %v432_v21 = vrot.slane %v2610_v23, 2  ;;  %v2622_v51 = vsel %vm542_vm0, %v638_v48, %v597_v47 }
  0xb3   : > { %v279_v50 = vpop.permute.xlu0 %278  ;;  %v2599_v39 = vsel %vm542_vm0, %v650_v14, %v613_v25  ;;  %v652_v13 = vrot.slane %v613_v25, 4  ;;  %v2625_v18 = vperm.slane %v655_v46, %v2487_v60  ;;  %v702_v35 = vrot.slane %v2590_v61, 4 }
  0xb4   : > { %3704 = vst [vmem:[#allocation14_spill] sm:$0xff] %v2592_v22  ;;  %v2629_v3 = vadd.f32 %v2592_v22, %v279_v50  ;;  %v431_v44 = vrot.slane %v2610_v23, 1  ;;  %v678_v47 = vrot.slane %v2605_v52, 4  ;;  %v2640_v25 = vadd.f32 %v2612_v27, %v286_v17 }
  0xb5   : > { %3707 = vst [vmem:[#allocation17_spill] sm:$0xff] %v2612_v27  ;;  %v2636_v10 = vsel %vm542_vm0, %v637_v32, %v652_v13  ;;  %v437_v46 = vrot.slane %v2610_v23, 7  ;;  %v2644_v15 = vperm.slane %v433_v16, 0  ;;  %v2650_v4 = vperm.slane %v432_v21, 0 }
  0xb6   : > { %v679_v50 = vsel %vm542_vm0, %v678_v47, %v2629_v3  ;;  %v703_v13 = vsel %vm542_vm0, %v702_v35, %v2625_v18  ;;  %v2654_v32 = vperm.slane %v431_v44, 0  ;;  %v616_v6 = vrot.slane %v2543_v0, 4 }
  0xb7   : > { %3708 = vst [vmem:[#allocation18_spill] sm:$0xff] %v2644_v15  ;;  %v436_v5 = vrot.slane %v2610_v23, 6  ;;  %v685_v47 = vperm.slane %v679_v50, %v2487_v60  ;;  %v709_v35 = vperm.slane %v703_v13, %v2531_v24  ;;  %v2665_v44 = vperm.slane %v437_v46, 0 }
  0xb8   : > { %3709 = vst [vmem:[#allocation19_spill] sm:$0xff] %v2650_v4  ;;  %v435_v0 = vrot.slane %v2610_v23, 5  ;;  %v2673_v8 = vadd.f32 %v2654_v32, %v2561_v30  ;;  %v434_v50 = vrot.slane %v2610_v23, 4  ;;  %v356_v16 = vpop.permute.xlu2 %355  ;;  %v3712_v13 = vperm.slane %v2610_v23, 0 }
  0xb9   : > { %3710 = vst [vmem:[#allocation20_spill] sm:$0xff] %v2654_v32  ;;  %v617_v22 = vsel %vm542_vm0, %v2534_v58, %v616_v6  ;;  %v752_v32 = vrot.slane %v709_v35, 4  ;;  %v2688_v20 = vperm.slane %v436_v5, 0  ;;  %v2691_v27 = vadd.f32 %v2665_v44, %v356_v16 }
  0xba   : > { %v307_v54 = vpop.permute.xlu1 %306  ;;  %3711 = vst [vmem:[#allocation21_spill] sm:$0xff] %v2665_v44  ;;  %v2704_v58 = vperm.slane %v617_v22, %v2531_v24  ;;  %v592_v5 = vrot.slane %v2519_v49, 4  ;;  %v2719_v22 = vld [vmem:[%s3635_s1 + $0x18] sm:$0xff] }
  0xbb   : > { %v300_v14 = vpop.permute.xlu0 %299  ;;  %v2680_v46 = vadd.f32 %v3712_v13, %v307_v54  ;;  %3713 = vst [vmem:[#allocation22_spill] sm:$0xff] %v2688_v20  ;;  %v2698_v13 = vperm.slane %v435_v0, 0  ;;  %v440_v42 = vrot.slane %v2719_v22, 3 }
  0xbc   : > { %v2632_v11 = vadd.f32 %v2594_v36, %v300_v14  ;;  %3716 = vst [vmem:[#allocation25_spill] sm:$0xff] %v2719_v22  ;;  %v704_v36 = vrot.slane %v2625_v18, 4 }
  0xbd   : > { %3714 = vst [vmem:[#allocation23_spill] sm:$0xff] %v2698_v13 }
  0xbe   : > { %v690_v48 = vrot.slane %v2632_v11, 4 }
  0xc0   : > { %v691_v14 = vsel %vm542_vm0, %v690_v48, %v2640_v25 }
  0xc1   : > { %v697_v17 = vperm.slane %v691_v14, %v2487_v60 }
  0xc2   : > { %v328_v12 = vpop.permute.xlu1 %327 }
  0xc3   : > { %v726_v7 = vrot.slane %v697_v17, 4  ;;  %v2662_v21 = vadd.f32 %v2644_v15, %v328_v12  ;;  %v321_v48 = vpop.permute.xlu0 %320 }
  0xc4   : > { %v2668_v14 = vadd.f32 %v2650_v4, %v321_v48 }
  0xc5   : > { %v778_v12 = vrot.slane %v2662_v21, 4  ;;  %v727_v15 = vsel %vm542_vm0, %v726_v7, %v685_v47 }
  0xc6   : > { %v766_v48 = vrot.slane %v2668_v14, 4  ;;  %v733_v4 = vperm.slane %v727_v15, %v2531_v24  ;;  %v2700_v15 = vperm.slane %v434_v50, 0 }
  0xc7   : > { %v779_v30 = vsel %vm542_vm0, %v778_v12, %v2673_v8 }
  0xc8   : > { %v2694_v7 = vperm.slane %v779_v30, %v2487_v60  ;;  %v767_v54 = vsel %vm542_vm0, %v766_v48, %v2680_v46  ;;  %3715 = vst [vmem:[#allocation24_spill] sm:$0xff] %v2700_v15  ;;  %v753_v6 = vsel %vm542_vm0, %v733_v4, %v752_v32  ;;  %v802_v48 = vrot.slane %v2691_v27, 4 }
  0xc9   : > { %996 = vrot.lane.b32.xlu0 %v753_v6, %s2272_s7  ;;  %v2710_v30 = vperm.slane %v767_v54, %v2487_v60  ;;  %v593_v32 = vsel %vm542_vm0, %v2505_v55, %v592_v5  ;;  %v2728_v54 = vadd.f32 %v2700_v15, %v2617_v33 }
  0xca   : > { %v814_v16 = vrot.slane %v2694_v7, 4  ;;  %v349_v12 = vpop.permute.xlu1 %348  ;;  %v2743_v33 = vperm.slane %v593_v32, %v2531_v24 }
  0xcb   : > { %v2713_v0 = vadd.f32 %v2688_v20, %v349_v12  ;;  %v342_v50 = vpop.permute.xlu0 %341  ;;  %v642_v12 = vrot.slane %v2704_v58, 4  ;;  %v750_v20 = vrot.slane %v733_v4, 4 }
  0xcc   : > { %v2722_v49 = vadd.f32 %v2698_v13, %v342_v50  ;;  %v815_v44 = vsel %vm542_vm0, %v814_v16, %v2710_v30  ;;  %v439_v50 = vrot.slane %v2719_v22, 2  ;;  %v728_v13 = vrot.slane %v685_v47, 4 }
  0xcd   : > { %v790_v6 = vrot.slane %v2713_v0, 4  ;;  %v821_v4 = vperm.slane %v815_v44, %v2531_v24  ;;  %v2755_v32 = vsel %vm542_vm0, %v750_v20, %v709_v35  ;;  %v438_v20 = vrot.slane %v2719_v22, 1 }
  0xce   : > { %v803_v23 = vsel %vm542_vm0, %v802_v48, %v2722_v49  ;;  %v643_v48 = vsel %vm542_vm0, %v642_v12, %v2743_v33  ;;  %v2757_v47 = vperm.slane %v439_v50, 0  ;;  %v2774_v50 = vperm.slane %v440_v42, 0 }
  0xcf   : > { %v791_v55 = vsel %vm542_vm0, %v790_v6, %v2728_v54  ;;  %v2740_v5 = vperm.slane %v803_v23, %v2487_v60  ;;  %v729_v23 = vsel %vm542_vm0, %v697_v17, %v728_v13  ;;  %v864_v12 = vrot.slane %v821_v4, 4 }
  0xd0   : > { %v2746_v15 = vperm.slane %v791_v55, %v2487_v60  ;;  %3717 = vst [vmem:[#allocation26_spill] sm:$0xff] %v2757_v47  ;;  %v2765_v34 = vperm.slane %v729_v23, %v2531_v24  ;;  %v3684_v17 = vperm.slane %v2719_v22, 0  ;;  %v444_v42 = vrot.slane %v2719_v22, 7 }
  0xd1   : > { %v838_v16 = vrot.slane %v2740_v5, 4  ;;  %1010 = vrot.lane.b32.xlu0 %v643_v48, %s2273_s20  ;;  %v377_v48 = vpop.permute.xlu2 %376  ;;  %3718 = vst [vmem:[#allocation27_spill] sm:$0xff] %v2774_v50  ;;  %v644_v62 = vrot.slane %v2743_v33, 4 }
  0xd2   : > { %v370_v6 = vpop.permute.xlu1 %369  ;;  %v2772_v18 = vadd.f32 %v2757_v47, %v377_v48  ;;  %v754_v23 = vrot.slane %v2765_v34, 4  ;;  %v2809_v47 = vperm.slane %v444_v42, 0  ;;  %v668_v42 = vrot.slane %v2567_v1, 4 }
  0xd3   : > { %v363_v55 = vpop.permute.xlu0 %362  ;;  %v839_v44 = vsel %vm542_vm0, %v838_v16, %v2746_v15  ;;  %v705_v16 = vsel %vm542_vm0, %v2590_v61, %v704_v36 }
  0xd4   : > { %v845_v26 = vperm.slane %v839_v44, %v2531_v24  ;;  %v2779_v44 = vperm.slane %v438_v20, 0  ;;  %v2783_v38 = vadd.f32 %v3684_v17, %v363_v55  ;;  %v2789_v48 = vperm.slane %v705_v16, %v2531_v24 }
  0xd5   : > { %v878_v61 = vrot.slane %v2772_v18, 4  ;;  %v443_v20 = vrot.slane %v2719_v22, 6  ;;  %v442_v55 = vrot.slane %v2719_v22, 5  ;;  %v669_v33 = vsel %vm542_vm0, %v2557_v31, %v668_v42 }
  0xd6   : > { %v862_v35 = vrot.slane %v845_v26, 4  ;;  %v865_v13 = vsel %vm542_vm0, %v845_v26, %v864_v12  ;;  %3719 = vst [vmem:[#allocation28_spill] sm:$0xff] %v2779_v44  ;;  %v2803_v16 = vadd.f32 %v2779_v44, %v370_v6 }
  0xd7   : > { %998 = vrot.lane.b32.xlu1 %v865_v13, %s2272_s7  ;;  %v441_v13 = vrot.slane %v2719_v22, 4  ;;  %v879_v17 = vsel %vm542_vm0, %v878_v61, %v2783_v38 }
  0xd8   : > { %v2786_v26 = vsel %vm542_vm0, %v862_v35, %v821_v4  ;;  %v755_v4 = vsel %vm542_vm0, %v754_v23, %v2789_v48  ;;  %v804_v35 = vrot.slane %v2722_v49, 4  ;;  %v2815_v23 = vperm.slane %v442_v55, 0 }
  0xd9   : > { %v885_v49 = vperm.slane %v879_v17, %v2487_v60  ;;  %v398_v44 = vpop.permute.xlu2 %397  ;;  %v2821_v56 = vperm.slane %v441_v13, 0  ;;  %v780_v55 = vrot.slane %v2673_v8, 4  ;;  %v792_v17 = vrot.slane %v2728_v54, 4 }
  0xda   : > { %v391_v63 = vpop.permute.xlu1 %390  ;;  %3720 = vst [vmem:[#allocation29_spill] sm:$0xff] %v2815_v23  ;;  %v805_v61 = vsel %vm542_vm0, %v2691_v27, %v804_v35  ;;  %v2834_v27 = vadd.f32 %v2815_v23, %v398_v44  ;;  %v645_v54 = vsel %vm542_vm0, %v2704_v58, %v644_v62  ;;  %v840_v62 = vrot.slane %v2746_v15, 4 }
  0xdb   : > { %v384_v12 = vpop.permute.xlu0 %383  ;;  %v2837_v13 = vperm.slane %v805_v61, %v2487_v60  ;;  %v928_v1 = vrot.slane %v885_v49, 4  ;;  %v781_v44 = vsel %vm542_vm0, %v2662_v21, %v780_v55  ;;  %v793_v23 = vsel %vm542_vm0, %v2713_v0, %v792_v17 }
  0xdc   : > { %v2794_v36 = vadd.f32 %v2774_v50, %v384_v12  ;;  %v2813_v50 = vperm.slane %v443_v20, 0  ;;  %v692_v21 = vrot.slane %v2640_v25, 4  ;;  %v680_v0 = vrot.slane %v2629_v3, 4 }
  0xdd   : > { %v850_v58 = vrot.slane %v2837_v13, 4  ;;  %v2876_v25 = vperm.slane %v793_v23, %v2487_v60  ;;  %v841_v3 = vsel %vm542_vm0, %v2740_v5, %v840_v62 }
  0xde   : > { %v890_v12 = vrot.slane %v2794_v36, 4  ;;  %v693_v17 = vsel %vm542_vm0, %v2632_v11, %v692_v21  ;;  %v656_v21 = vrot.slane %v2583_v28, 4 }
  0xdf   : > { %1012 = vrot.lane.b32.xlu1 %v755_v4, %s2273_s20  ;;  %v2888_v23 = vperm.slane %v693_v17, %v2487_v60 }
  0xe0   : > { %v891_v22 = vsel %vm542_vm0, %v890_v12, %v2803_v16  ;;  %v657_v28 = vsel %vm542_vm0, %v2564_v43, %v656_v21 }
  0xe1   : > { %v897_v6 = vperm.slane %v891_v22, %v2487_v60  ;;  %v2924_v43 = vperm.slane %v657_v28, %v2487_v60  ;;  %v880_v28 = vrot.slane %v2783_v38, 4 }
  0xe2   : > { %v412_v4 = vpop.permute.xlu1 %411 }
  0xe3   : > { %v926_v53 = vrot.slane %v897_v6, 4  ;;  %v2825_v12 = vadd.f32 %v2809_v47, %v412_v4  ;;  %v405_v20 = vpop.permute.xlu0 %404  ;;  %v2841_v4 = vadd.f32 %v2821_v56, %v391_v63  ;;  %v929_v63 = vsel %vm542_vm0, %v897_v6, %v928_v1 }
  0xe4   : > { %v2830_v22 = vadd.f32 %v2813_v50, %v405_v20  ;;  %v2866_v6 = vperm.slane %v669_v33, %v2487_v60  ;;  %v937_v15 = vperm.slane %v929_v63, %v2531_v24  ;;  %v2873_v1 = vperm.slane %v781_v44, %v2487_v60 }
  0xe5   : > { %v914_v35 = vrot.slane %v2825_v12, 4  ;;  %v927_v20 = vsel %vm542_vm0, %v926_v53, %v885_v49  ;;  %v851_v44 = vsel %vm542_vm0, %v850_v58, %v2876_v25  ;;  %v881_v38 = vsel %vm542_vm0, %v2772_v18, %v880_v28 }
  0xe6   : > { %v902_v8 = vrot.slane %v2830_v22, 4  ;;  %v933_v42 = vperm.slane %v927_v20, %v2531_v24  ;;  %v980_v63 = vrot.slane %v937_v15, 4 }
  0xe7   : > { %v915_v61 = vsel %vm542_vm0, %v914_v35, %v2834_v27  ;;  %1026 = vrot.lane.b32.xlu1 %v645_v54, %s2274_s23  ;;  %v816_v54 = vrot.slane %v2710_v30, 4 }
  0xe8   : > { %v921_v53 = vperm.slane %v915_v61, %v2487_v60  ;;  %v903_v31 = vsel %vm542_vm0, %v902_v8, %v2841_v4  ;;  %v768_v8 = vrot.slane %v2680_v46, 4  ;;  %v976_v61 = vrot.slane %v933_v42, 4 }
  0xe9   : > { %v909_v49 = vperm.slane %v903_v31, %v2487_v60  ;;  %v826_v31 = vrot.slane %v2873_v1, 4  ;;  %v817_v17 = vsel %vm542_vm0, %v2694_v7, %v816_v54 }
  0xea   : > { %v950_v55 = vrot.slane %v921_v53, 4  ;;  %v769_v46 = vsel %vm542_vm0, %v2668_v14, %v768_v8  ;;  %v681_v8 = vsel %vm542_vm0, %v2605_v52, %v680_v0 }
  0xeb   : > { %v952_v35 = vrot.slane %v909_v49, 4  ;;  %v2903_v14 = vperm.slane %v769_v46, %v2487_v60  ;;  %v2927_v52 = vperm.slane %v681_v8, %v2487_v60 }
  0xec   : > { %v951_v20 = vsel %vm542_vm0, %v950_v55, %v909_v49  ;;  %v2900_v55 = vperm.slane %v851_v44, %v2531_v24 }
  0xed   : > { %v953_v33 = vsel %vm542_vm0, %v921_v53, %v952_v35  ;;  %v957_v11 = vperm.slane %v951_v20, %v2531_v24  ;;  %v849_v53 = vperm.slane %v841_v3, %v2531_v24  ;;  %v714_v3 = vrot.slane %v2866_v6, 4 }
  0xee   : > { %v961_v30 = vperm.slane %v953_v33, %v2531_v24  ;;  %v738_v33 = vrot.slane %v2888_v23, 4  ;;  %v827_v7 = vsel %vm542_vm0, %v826_v31, %v2903_v14 }
  0xef   : > { %v974_v5 = vrot.slane %v957_v11, 4  ;;  %v977_v62 = vsel %vm542_vm0, %v957_v11, %v976_v61  ;;  %v866_v54 = vrot.slane %v849_v53, 4  ;;  %v825_v11 = vperm.slane %v817_v17, %v2531_v24 }
  0xf0   : > { %v981_v58 = vsel %vm542_vm0, %v961_v30, %v980_v63  ;;  %1000 = vrot.lane.b32.xlu2 %v977_v62, %s2272_s7  ;;  %v978_v49 = vrot.slane %v961_v30, 4  ;;  %v2930_v0 = vperm.slane %v827_v7, %v2531_v24  ;;  %v715_v44 = vsel %vm542_vm0, %v714_v3, %v2924_v43 }
  0xf1   : > { %1032 = vrot.lane.b32.xlu1 %v981_v58, %s2274_s23  ;;  %v2909_v35 = vsel %vm542_vm0, %v974_v5, %v933_v42  ;;  %v870_v42 = vrot.slane %v2900_v55, 4  ;;  %v867_v61 = vsel %vm542_vm0, %v866_v54, %v825_v11  ;;  %v739_v46 = vsel %vm542_vm0, %v738_v33, %v2927_v52 }
  0xf2   : > { %v979_v20 = vsel %vm542_vm0, %v978_v49, %v937_v15  ;;  %v916_v15 = vrot.slane %v2834_v27, 4  ;;  %v904_v30 = vrot.slane %v2841_v4, 4  ;;  %v868_v31 = vrot.slane %v825_v11, 4 }
  0xf3   : > { %1016 = vrot.lane.b32.xlu0 %v979_v20, %s2273_s20  ;;  %v871_v63 = vsel %vm542_vm0, %v870_v42, %v2930_v0  ;;  %v721_v21 = vperm.slane %v715_v44, %v2531_v24  ;;  %v745_v4 = vperm.slane %v739_v46, %v2531_v24  ;;  %v892_v58 = vrot.slane %v2803_v16, 4 }
  0xf4   : > { %v917_v5 = vsel %vm542_vm0, %v2825_v12, %v916_v15  ;;  %v905_v27 = vsel %vm542_vm0, %v2830_v22, %v904_v30  ;;  %v869_v62 = vsel %vm542_vm0, %v849_v53, %v868_v31  ;;  %v756_v17 = vrot.slane %v2789_v48, 4 }
  0xf5   : > { %v925_v49 = vperm.slane %v917_v5, %v2487_v60  ;;  %v913_v12 = vperm.slane %v905_v27, %v2487_v60  ;;  %v893_v22 = vsel %vm542_vm0, %v2794_v36, %v892_v58  ;;  %v760_v53 = vrot.slane %v721_v21, 4 }
  0xf6   : > { %v758_v8 = vrot.slane %v745_v4, 4  ;;  %v757_v20 = vsel %vm542_vm0, %v2765_v34, %v756_v17  ;;  %v901_v16 = vperm.slane %v893_v22, %v2487_v60  ;;  %v889_v36 = vperm.slane %v881_v38, %v2487_v60 }
  0xf7   : > { %v962_v3 = vrot.slane %v925_v49, 4  ;;  %v761_v33 = vsel %vm542_vm0, %v745_v4, %v760_v53  ;;  %v964_v7 = vrot.slane %v913_v12, 4  ;;  %v828_v44 = vrot.slane %v2903_v14, 4 }
  0xf8   : > { %1014 = vrot.lane.b32.xlu2 %v867_v61, %s2273_s20  ;;  %v759_v48 = vsel %vm542_vm0, %v758_v8, %v721_v21  ;;  %v938_v54 = vrot.slane %v901_v16, 4  ;;  %v940_v61 = vrot.slane %v889_v36, 4  ;;  %v852_v46 = vrot.slane %v2876_v25, 4 }
  0xf9   : > { %1046 = vrot.lane.b32.xlu1 %v871_v63, %s2275_s24  ;;  %v963_v34 = vsel %vm542_vm0, %v962_v3, %v913_v12  ;;  %v965_v42 = vsel %vm542_vm0, %v925_v49, %v964_v7  ;;  %v872_v49 = vrot.slane %v2930_v0, 4  ;;  %v3724_v38 = vperm.slane %v2358_v2, 6 }
  0xfa   : > { %v969_v11 = vperm.slane %v963_v34, %v2531_v24  ;;  %v973_v15 = vperm.slane %v965_v42, %v2531_v24  ;;  %v939_v18 = vsel %vm542_vm0, %v938_v54, %v889_v36  ;;  %v941_v30 = vsel %vm542_vm0, %v901_v16, %v940_v61 }
  0xfb   : > { %1030 = vrot.lane.b32.xlu0 %v869_v62, %s2274_s23  ;;  %v945_v31 = vperm.slane %v939_v18, %v2531_v24  ;;  %v949_v5 = vperm.slane %v941_v30, %v2531_v24  ;;  %v853_v14 = vsel %vm542_vm0, %v2837_v13, %v852_v46  ;;  %v740_v62 = vrot.slane %v2927_v52, 4 }
  0xfc   : > { %v982_v63 = vrot.slane %v969_v11, 4  ;;  %v861_v58 = vperm.slane %v853_v14, %v2531_v24  ;;  %v873_v52 = vsel %vm542_vm0, %v2900_v55, %v872_v49  ;;  %v3726_v34 = vperm.slane %v2358_v2, 2 }
  0xfd   : > { %v741_v13 = vsel %vm542_vm0, %v2888_v23, %v740_v62  ;;  %v988_v16 = vrot.slane %v949_v5, 4  ;;  %v3728_v36 = vperm.slane %v2381_v9, 0  ;;  %v3729_v54 = vperm.slane %v2358_v2, 4 }
  0xfe   : > { %v983_v27 = vsel %vm542_vm0, %v982_v63, %v945_v31  ;;  %v874_v17 = vrot.slane %v861_v58, 4  ;;  %v749_v28 = vperm.slane %v741_v13, %v2531_v24  ;;  %v3730_v42 = vperm.slane %v2381_v9, 4 }
  0xff   : > { %v989_v7 = vsel %vm542_vm0, %v973_v15, %v988_v16  ;;  %v3732_v61 = vperm.slane %v2358_v2, 7  ;;  %v3734_v30 = vperm.slane %v2381_v9, 6  ;;  %v3735_v63 = vperm.slane %v2381_v9, 2 }
 0x100   : > { %1028 = vrot.lane.b32.xlu2 %v757_v20, %s2274_s23  ;;  %v762_v0 = vrot.slane %v749_v28, 4  ;;  %v3721_v20 = vperm.slane %v2358_v2, 1  ;;  %v3739_v62 = vperm.slane %v2411_v19, 4  ;;  %v3742_v49 = vperm.slane %v2411_v19, 7 }
 0x101   : > { %1060 = vrot.lane.b32.xlu1 %v761_v33, %s2276_s25  ;;  %v3723_v33 = vperm.slane %v2358_v2, 0 }
 0x103   : > { %1044 = vrot.lane.b32.xlu0 %v759_v48, %s2275_s24  ;;  %v3725_v48 = vperm.slane %v2358_v2, 5 }
 0x108   : > { %1042 = vrot.lane.b32.xlu2 %v2602_v37, %s2275_s24  ;;  %v986_v37 = vrot.slane %v973_v15, 4  ;;  %v3731_v15 = vperm.slane %v2381_v9, 3 }
 0x109   : > { %1074 = vrot.lane.b32.xlu1 %v2599_v39, %s2277_s26  ;;  %v829_v39 = vsel %vm542_vm0, %v2873_v1, %v828_v44  ;;  %v716_v1 = vrot.slane %v2924_v43, 4  ;;  %v3733_v44 = vperm.slane %v2381_v9, 7 }
 0x10a   : > { %v987_v25 = vsel %vm542_vm0, %v986_v37, %v949_v5  ;;  %v837_v4 = vperm.slane %v829_v39, %v2531_v24  ;;  %v2187_v39 = vld [vmem:[%s3634_s0 + $0x8] sm:$0xff] }
 0x10b   : > { %1058 = vrot.lane.b32.xlu0 %v2615_v40, %s2276_s25  ;;  %v984_v40 = vrot.slane %v945_v31, 4  ;;  %v717_v23 = vsel %vm542_vm0, %v2866_v6, %v716_v1  ;;  %v3722_v6 = vperm.slane %v2358_v2, 3  ;;  %v3736_v31 = vperm.slane %v2411_v19, 2 }
 0x10c   : > { %v876_v12 = vrot.slane %v837_v4, 4  ;;  %v875_v43 = vsel %vm542_vm0, %v874_v17, %v837_v4  ;;  %v725_v53 = vperm.slane %v717_v23, %v2531_v24  ;;  %v1236_v14 = vperm.slane %v2187_v39, 5 }
 0x10d   : > { %v985_v21 = vsel %vm542_vm0, %v969_v11, %v984_v40  ;;  %v995_v11 = vpop.permute.xlu2 %994  ;;  %v3740_v4 = vperm.slane %v2411_v19, 0  ;;  %v3743_v17 = vperm.slane %v2411_v19, 3  ;;  %v3745_v23 = vperm.slane %v2441_v29, 2 }
 0x10e   : > { %v877_v22 = vsel %vm542_vm0, %v861_v58, %v876_v12  ;;  %v763_v55 = vsel %vm542_vm0, %v762_v0, %v725_v53  ;;  %v764_v8 = vrot.slane %v725_v53, 4  ;;  %v3741_v58 = vperm.slane %v2441_v29, 0 }
 0x10f   : > { %v1103_v16 = vsel %vm1102_vm1, %v2622_v51, %v995_v11 }
 0x110   : > { %1048 = vrot.lane.b32.xlu2 %v983_v27, %s2275_s24  ;;  %v765_v3 = vsel %vm542_vm0, %v749_v28, %v764_v8  ;;  %v3737_v27 = vperm.slane %v2411_v19, 1 }
 0x111   : > { %1080 = vrot.lane.b32.xlu1 %v987_v25, %s2277_s26 }
 0x113   : > { %1064 = vrot.lane.b32.xlu0 %v985_v21, %s2276_s25 }
 0x118   : > { %1062 = vrot.lane.b32.xlu2 %v873_v52, %s2276_s25  ;;  %v3744_v52 = vperm.slane %v2441_v29, 3 }
 0x119   : > { %1094 = vrot.lane.b32.xlu1 %v877_v22, %s2278_s27 }
 0x11b   : > { %1078 = vrot.lane.b32.xlu0 %v875_v43, %s2277_s26  ;;  %v2188_v43 = vld [vmem:[%s3634_s0 + $0x10] sm:$0xff] }
 0x11c   : > { %v1299_v0 = vperm.slane %v2188_v43, 6 }
 0x120   : > { %1076 = vrot.lane.b32.xlu2 %v763_v55, %s2277_s26  ;;  %v3746_v55 = vperm.slane %v2441_v29, 6 }
 0x121   : > { %1157 = vperm.xlu1 %2185, %v3721_v20   ;;  %v3747_v20 = vperm.slane %v2441_v29, 5 }
 0x123   : > { %1092 = vrot.lane.b32.xlu0 %v765_v3, %s2278_s27 }
 0x128   : > { %1090 = vrot.lane.b32.xlu2 %v2636_v10, %s2278_s27  ;;  %v3727_v10 = vperm.slane %v2381_v9, 1  ;;  %v3738_v9 = vperm.slane %v2411_v19, 5 }
 0x129   : > { %1171 = vperm.xlu1 %2185, %v3722_v6   ;;  %v3748_v6 = vperm.slane %v2441_v29, 1 }
 0x12b   : > { %1150 = vperm.xlu0 %2184, %v3723_v33  }
 0x130   : > { %1096 = vrot.lane.b32.xlu2 %v989_v7, %s2278_s27 }
 0x131   : > { %1192 = vperm.xlu1 %2185, %v3724_v38  }
 0x133   : > { %1185 = vperm.xlu0 %2184, %v3725_v48   ;;  %v2189_v48 = vld [vmem:[%s3634_s0 + $0x18] sm:$0xff] }
 0x138   : > { %1164 = vperm.xlu2 %2186, %v3726_v34   ;;  %v1341_v34 = vperm.slane %v2189_v48, 4 }
 0x139   : > { %1213 = vperm.xlu1 %2185, %v3727_v10  }
 0x13b   : > { %1206 = vperm.xlu0 %2184, %v3728_v36   ;;  %v3059_v2 = vpop.permute.xlu0 %996 }
 0x140   : > { %1178 = vperm.xlu2 %2186, %v3729_v54  }
 0x141   : > { %1234 = vperm.xlu1 %2185, %v3730_v42  }
 0x143   : > { %1227 = vperm.xlu0 %2184, %v3731_v15   ;;  %v1011_v21 = vpop.permute.xlu0 %1010 }
 0x144   : > { %v1108_v38 = vsel %vm1107_vm2, %v1103_v16, %v1011_v21  ;;  %v3750_v16 = vld [vmem:[#allocation5_spill] sm:$0xff] }
 0x148   : > { %1199 = vperm.xlu2 %2186, %v3732_v61  }
 0x149   : > { %v3045_v18 = vpop.permute.xlu1 %998  ;;  %1255 = vperm.xlu1 %2185, %v3733_v44  }
 0x14a   : > { %v1001_v46 = vpop.permute.xlu2 %1000 }
 0x14b   : > { %1248 = vperm.xlu0 %2184, %v3734_v30   ;;  %v1106_v54 = vsel %vm1102_vm1, %v2909_v35, %v1001_v46  ;;  %v1362_v30 = vperm.slane %v2189_v48, 7  ;;  %v1105_v46 = vsel %vm1102_vm1, %v2786_v26, %v3045_v18 }
 0x150   : > { %1220 = vperm.xlu2 %2186, %v3735_v63  }
 0x151   : > { %v3053_v37 = vpop.permute.xlu1 %1012  ;;  %1276 = vperm.xlu1 %2185, %v3736_v31  }
 0x152   : > { %v3057_v5 = vpop.permute.xlu2 %1014 }
 0x153   : > { %1269 = vperm.xlu0 %2184, %v3737_v27   ;;  %v1110_v39 = vsel %vm1107_vm2, %v1105_v46, %v3057_v5  ;;  %v1104_v5 = vsel %vm1102_vm1, %v2755_v32, %v3059_v2  ;;  %v3753_v46 = vld [vmem:[#allocation6_spill] sm:$0xff] }
 0x158   : > { %1241 = vperm.xlu2 %2186, %v1236_v14  }
 0x159   : > { %1297 = vperm.xlu1 %2185, %v3738_v9   ;;  %v1027_v40 = vpop.permute.xlu1 %1026 }
 0x15a   : > { %v3068_v25 = vpop.permute.xlu2 %1028  ;;  %v1113_v29 = vsel %vm1112_vm3, %v1108_v38, %v1027_v40 }
 0x15b   : > { %1290 = vperm.xlu0 %2184, %v3739_v62  }
 0x160   : > { %1262 = vperm.xlu2 %2186, %v3740_v4  }
 0x161   : > { %1318 = vperm.xlu1 %2185, %v3741_v58  }
 0x162   : > { %v1043_v13 = vpop.permute.xlu2 %1042 }
 0x163   : > { %v1033_v1 = vpop.permute.xlu1 %1032  ;;  %1311 = vperm.xlu0 %2184, %v3742_v49   ;;  %v1118_v36 = vsel %vm1117_vm4, %v1113_v29, %v1043_v13  ;;  %v1109_v13 = vsel %vm1107_vm2, %v1104_v5, %v3053_v37 }
 0x164   : > { %v1114_v49 = vsel %vm1112_vm3, %v1109_v13, %v3068_v25 }
 0x165   : > { %v1017_v12 = vpop.permute.xlu0 %1016 }
 0x166   : > { %v1111_v42 = vsel %vm1107_vm2, %v1106_v54, %v1017_v12 }
 0x167   : > { %v1116_v63 = vsel %vm1112_vm3, %v1111_v42, %v1033_v1  ;;  %v3752_v42 = vld [vmem:[#allocation8_spill] sm:$0xff] }
 0x168   : > { %1283 = vperm.xlu2 %2186, %v3743_v17  }
 0x169   : > { %1339 = vperm.xlu1 %2185, %v3744_v52  }
 0x16a   : > { %v1049_v28 = vpop.permute.xlu2 %1048 }
 0x16b   : > { %v1047_v22 = vpop.permute.xlu1 %1046  ;;  %1332 = vperm.xlu0 %2184, %v3745_v23   ;;  %v1121_v35 = vsel %vm1117_vm4, %v1116_v63, %v1049_v28 }
 0x16d   : > { %v1031_v53 = vpop.permute.xlu0 %1030 }
 0x16e   : > { %v1115_v14 = vsel %vm1112_vm3, %v1110_v39, %v1031_v53 }
 0x16f   : > { %v1120_v4 = vsel %vm1117_vm4, %v1115_v14, %v1047_v22 }
 0x170   : > { %1304 = vperm.xlu2 %2186, %v1299_v0  }
 0x171   : > { %1360 = vperm.xlu1 %2185, %v3746_v55  }
 0x172   : > { %v1063_v19 = vpop.permute.xlu2 %1062 }
 0x173   : > { %v1061_v8 = vpop.permute.xlu1 %1060  ;;  %1353 = vperm.xlu0 %2184, %v3747_v20   ;;  %v1125_v26 = vsel %vm1122_vm5, %v1120_v4, %v1063_v19 }
 0x175   : > { %v1045_v3 = vpop.permute.xlu0 %1044 }
 0x176   : > { %v1119_v12 = vsel %vm1117_vm4, %v1114_v49, %v1045_v3 }
 0x177   : > { %v1124_v28 = vsel %vm1122_vm5, %v1119_v12, %v1061_v8  ;;  %v3749_v8 = vperm.slane %v2467_v41, 0 }
 0x178   : > { %1325 = vperm.xlu2 %2186, %v3748_v6  }
 0x17a   : > { %v1077_v33 = vpop.permute.xlu2 %1076 }
 0x17b   : > { %v1075_v7 = vpop.permute.xlu1 %1074  ;;  %v1129_v22 = vsel %vm1127_vm7, %v1124_v28, %v1077_v33 }
 0x17d   : > { %v1059_v10 = vpop.permute.xlu0 %1058 }
 0x17e   : > { %v1123_v51 = vsel %vm1122_vm5, %v1118_v36, %v1059_v10  ;;  %v3751_v36 = vld [vmem:[#allocation7_spill] sm:$0xff] }
 0x17f   : > { %v1128_v15 = vsel %vm1127_vm7, %v1123_v51, %v1075_v7 }
 0x180   : > { %1346 = vperm.xlu2 %2186, %v1341_v34  }
 0x182   : > { %v1091_v11 = vpop.permute.xlu2 %1090 }
 0x183   : > { %v1081_v61 = vpop.permute.xlu1 %1080  ;;  %v1133_v44 = vsel %vm1132_vm6, %v1128_v15, %v1091_v11 }
 0x184   : > { %1137 = vst [vmem:[%s3110_s15] sm:$0xff] %v1133_v44 }
 0x185   : > { %v1065_v31 = vpop.permute.xlu0 %1064 }
 0x186   : > { %v1126_v27 = vsel %vm1122_vm5, %v1121_v35, %v1065_v31 }
 0x187   : > { %v1131_v9 = vsel %vm1127_vm7, %v1126_v27, %v1081_v61 }
 0x188   : > { %1367 = vperm.xlu2 %2186, %v1362_v30  }
 0x18a   : > { %v1097_v40 = vpop.permute.xlu2 %1096 }
 0x18b   : > { %v1095_v62 = vpop.permute.xlu1 %1094  ;;  %v1136_v21 = vsel %vm1132_vm6, %v1131_v9, %v1097_v40 }
 0x18c   : > { %1140 = vst [vmem:[%s3110_s15 + $0x30] sm:$0xff] %v1136_v21 }
 0x18d   : > { %v1079_v18 = vpop.permute.xlu0 %1078 }
 0x18e   : > { %v1130_v58 = vsel %vm1127_vm7, %v1125_v26, %v1079_v18 }
 0x18f   : > { %v1135_v1 = vsel %vm1132_vm6, %v1130_v58, %v1095_v62 }
 0x190   : > { %1139 = vst [vmem:[%s3110_s15 + $0x20] sm:$0xff] %v1135_v1 }
 0x192   : > { %v1165_v17 = vpop.permute.xlu2 %1164 }
 0x193   : > { %v1158_v52 = vpop.permute.xlu1 %1157  ;;  %v1371_v25 = vadd.f32 %v1165_v17, %v2471_v45 }
 0x194   : > { %v1370_v37 = vadd.f32 %v1158_v52, %v2485_v59 }
 0x195   : > { %v1093_v32 = vpop.permute.xlu0 %1092  ;;  %v1401_v6 = vrot.slane %v1371_v25, 4 }
 0x196   : > { %v1134_v2 = vsel %vm1132_vm6, %v1129_v22, %v1093_v32  ;;  %v1415_v0 = vrot.slane %v1370_v37, 4 }
 0x197   : > { %1138 = vst [vmem:[%s3110_s15 + $0x10] sm:$0xff] %v1134_v2 }
 0x19a   : > { %v1179_v23 = vpop.permute.xlu2 %1178 }
 0x19b   : > { %v1172_v43 = vpop.permute.xlu1 %1171  ;;  %v1373_v7 = vadd.f32 %v1179_v23, %v3750_v16 }
 0x19c   : > { %v1372_v53 = vadd.f32 %v1172_v43, %v2482_v57 }
 0x19d   : > { %v1151_v55 = vpop.permute.xlu0 %1150  ;;  %v1427_v54 = vrot.slane %v1373_v7, 4 }
 0x19e   : > { %v1413_v19 = vrot.slane %v1372_v53, 4  ;;  %v1416_v20 = vsel %vm542_vm0, %v1372_v53, %v1415_v0  ;;  %v1369_v3 = vadd.f32 %v1151_v55, %v3749_v8  ;;  %v3754_v55 = vld [vmem:[#allocation11_spill] sm:$0xff] }
 0x19f   : > { %v1424_v45 = vperm.slane %v1416_v20, %v2487_v60 }
 0x1a0   : > { %v1414_v33 = vsel %vm542_vm0, %v1413_v19, %v1370_v37  ;;  %v1403_v59 = vrot.slane %v1369_v3, 4  ;;  %v1402_v57 = vsel %vm542_vm0, %v1401_v6, %v1369_v3 }
 0x1a1   : > { %v3151_v38 = vperm.slane %v1414_v33, %v2487_v60  ;;  %v1461_v15 = vrot.slane %v1424_v45, 4  ;;  %v3161_v61 = vperm.slane %v1402_v57, %v2487_v60 }
 0x1a2   : > { %v1404_v48 = vsel %vm542_vm0, %v1371_v25, %v1403_v59  ;;  %v1200_v34 = vpop.permute.xlu2 %1199 }
 0x1a3   : > { %v1449_v29 = vrot.slane %v3151_v38, 4  ;;  %v1412_v41 = vperm.slane %v1404_v48, %v2487_v60  ;;  %v1193_v10 = vpop.permute.xlu1 %1192  ;;  %v1376_v51 = vadd.f32 %v1200_v34, %v3751_v36 }
 0x1a4   : > { %v1375_v11 = vadd.f32 %v1193_v10, %v3752_v42 }
 0x1a5   : > { %v1463_v44 = vrot.slane %v1412_v41, 4  ;;  %v1437_v30 = vrot.slane %v1376_v51, 4  ;;  %v1186_v63 = vpop.permute.xlu0 %1185  ;;  %v1450_v39 = vsel %vm542_vm0, %v1449_v29, %v3161_v61  ;;  %v1462_v14 = vsel %vm542_vm0, %v1461_v15, %v1412_v41  ;;  %v3755_v41 = vld [vmem:[#allocation9_spill] sm:$0xff]  ;;  %v3758_v15 = vld [vmem:[#allocation12_spill] sm:$0xff] }
 0x1a6   : > { %v1425_v31 = vrot.slane %v1375_v11, 4  ;;  %v1428_v35 = vsel %vm542_vm0, %v1375_v11, %v1427_v54  ;;  %v1374_v27 = vadd.f32 %v1186_v63, %v3753_v46  ;;  %v1456_v58 = vperm.slane %v1450_v39, %v2531_v24  ;;  %v3759_v39 = vld [vmem:[#allocation15_spill] sm:$0xff] }
 0x1a7   : > { %v1464_v9 = vsel %vm542_vm0, %v1424_v45, %v1463_v44  ;;  %v1436_v4 = vperm.slane %v1428_v35, %v2487_v60  ;;  %v1468_v37 = vperm.slane %v1462_v14, %v2531_v24  ;;  %v3756_v10 = vperm.slane %v3755_v41, 0  ;;  %v3765_v41 = vld [vmem:[#allocation19_spill] sm:$0xff] }
 0x1a8   : > { %v1426_v40 = vsel %vm542_vm0, %v1425_v31, %v1373_v7  ;;  %v1438_v62 = vsel %vm542_vm0, %v1437_v30, %v1374_v27  ;;  %v1439_v21 = vrot.slane %v1374_v27, 4  ;;  %v1499_v2 = vrot.slane %v1456_v58, 4 }
 0x1a9   : > { %v3173_v26 = vperm.slane %v1438_v62, %v2487_v60  ;;  %v3178_v13 = vperm.slane %v1426_v40, %v2487_v60  ;;  %v1487_v17 = vrot.slane %v1436_v4, 4  ;;  %v1472_v43 = vperm.slane %v1464_v9, %v2531_v24 }
 0x1aa   : > { %v1440_v18 = vsel %vm542_vm0, %v1376_v51, %v1439_v21  ;;  %v1221_v5 = vpop.permute.xlu2 %1220  ;;  %v1507_v3 = vrot.slane %v1468_v37, 4  ;;  %v3757_v51 = vld [vmem:[#allocation10_spill] sm:$0xff]  ;;  %v3760_v21 = vld [vmem:[#allocation17_spill] sm:$0xff] }
 0x1ab   : > { %v1448_v1 = vperm.slane %v1440_v18, %v2487_v60  ;;  %v1473_v49 = vrot.slane %v3173_v26, 4  ;;  %v1214_v12 = vpop.permute.xlu1 %1213  ;;  %v3191_v19 = vadd.f32 %v1221_v5, %v3754_v55  ;;  %v1511_v7 = vrot.slane %v1472_v43, 4  ;;  %v3761_v5 = vld [vmem:[#allocation13_spill] sm:$0xff] }
 0x1ac   : > { %v3220_v44 = vadd.f32 %v1214_v12, %v3758_v15 }
 0x1ad   : > { %v1485_v52 = vrot.slane %v1448_v1, 4  ;;  %v1207_v28 = vpop.permute.xlu0 %1206  ;;  %v1474_v22 = vsel %vm542_vm0, %v1473_v49, %v3178_v13  ;;  %v1488_v0 = vsel %vm542_vm0, %v1448_v1, %v1487_v17  ;;  %v1513_v48 = vrot.slane %v3191_v19, 4  ;;  %v3762_v49 = vld [vmem:[#allocation14_spill] sm:$0xff] }
 0x1ae   : > { %v1480_v32 = vperm.slane %v1474_v22, %v2531_v24  ;;  %v1496_v6 = vperm.slane %v1488_v0, %v2531_v24  ;;  %v3208_v36 = vadd.f32 %v1207_v28, %v3756_v10  ;;  %v1475_v28 = vrot.slane %v3178_v13, 4 }
 0x1af   : > { %v1486_v23 = vsel %vm542_vm0, %v1485_v52, %v1436_v4 }
 0x1b0   : > { %v1500_v25 = vsel %vm542_vm0, %v1480_v32, %v1499_v2  ;;  %v1497_v53 = vrot.slane %v1480_v32, 4  ;;  %v1492_v20 = vperm.slane %v1486_v23, %v2531_v24  ;;  %v1509_v57 = vrot.slane %v1496_v6, 4 }
 0x1b1   : > { %1853 = vrot.lane.b32.xlu0 %v1500_v25, %s2272_s7  ;;  %v3204_v29 = vsel %vm542_vm0, %v1496_v6, %v1511_v7  ;;  %v1514_v63 = vsel %vm542_vm0, %v1513_v48, %v3208_v36  ;;  %v3763_v25 = vld [vmem:[#allocation18_spill] sm:$0xff]  ;;  %v1451_v6 = vrot.slane %v3161_v61, 4 }
 0x1b2   : > { %v1242_v8 = vpop.permute.xlu2 %1241  ;;  %v3197_v33 = vsel %vm542_vm0, %v1497_v53, %v1456_v58  ;;  %v1505_v59 = vrot.slane %v1492_v20, 4  ;;  %v3200_v45 = vsel %vm542_vm0, %v1492_v20, %v1507_v3  ;;  %v3217_v11 = vsel %vm542_vm0, %v1509_v57, %v1472_v43  ;;  %v3764_v57 = vld [vmem:[#allocation20_spill] sm:$0xff] }
 0x1b3   : > { %v1235_v16 = vpop.permute.xlu1 %1234  ;;  %v3234_v9 = vperm.slane %v1514_v63, %v2487_v60  ;;  %v3238_v4 = vadd.f32 %v1242_v8, %v3760_v21  ;;  %v1476_v20 = vsel %vm542_vm0, %v3173_v26, %v1475_v28  ;;  %v1452_v61 = vsel %vm542_vm0, %v3151_v38, %v1451_v6 }
 0x1b4   : > { %v3214_v42 = vsel %vm542_vm0, %v1505_v59, %v1468_v37  ;;  %v3247_v12 = vadd.f32 %v1235_v16, %v3762_v49  ;;  %v3271_v7 = vperm.slane %v1476_v20, %v2531_v24 }
 0x1b5   : > { %v1228_v34 = vpop.permute.xlu0 %1227 }
 0x1b6   : > { %v3211_v54 = vadd.f32 %v1228_v34, %v3757_v51  ;;  %v1501_v51 = vrot.slane %v3271_v7, 4 }
 0x1b8   : > { %v1525_v30 = vrot.slane %v3211_v54, 4 }
 0x1ba   : > { %v1526_v31 = vsel %vm542_vm0, %v1525_v30, %v3220_v44  ;;  %v1263_v35 = vpop.permute.xlu2 %1262 }
 0x1bb   : > { %v3228_v46 = vperm.slane %v1526_v31, %v2487_v60  ;;  %v1256_v27 = vpop.permute.xlu1 %1255  ;;  %v3287_v31 = vperm.slane %v1452_v61, %v2531_v24 }
 0x1bc   : > { %v3231_v14 = vadd.f32 %v1256_v27, %v3759_v39 }
 0x1bd   : > { %v1561_v40 = vrot.slane %v3228_v46, 4  ;;  %v1249_v62 = vpop.permute.xlu0 %1248 }
 0x1be   : > { %v1549_v18 = vrot.slane %v3231_v14, 4  ;;  %v3242_v58 = vadd.f32 %v1249_v62, %v3761_v5  ;;  %v3766_v62 = vld [vmem:[#allocation16_spill] sm:$0xff] }
 0x1bf   : > { %v1562_v1 = vsel %vm542_vm0, %v1561_v40, %v3234_v9  ;;  %v1502_v40 = vsel %vm542_vm0, %v1501_v51, %v3287_v31  ;;  %v3767_v38 = vperm.slane %v3766_v62, 0  ;;  %v3774_v62 = vld [vmem:[#allocation26_spill] sm:$0xff] }
 0x1c0   : > { %v1550_v17 = vsel %vm542_vm0, %v1549_v18, %v3238_v4  ;;  %v1537_v52 = vrot.slane %v3242_v58, 4  ;;  %v1568_v37 = vperm.slane %v1562_v1, %v2531_v24  ;;  %v3768_v18 = vld [vmem:[#allocation22_spill] sm:$0xff] }
 0x1c1   : > { %v3254_v22 = vperm.slane %v1550_v17, %v2487_v60  ;;  %v3297_v21 = vadd.f32 %v1263_v35, %v3767_v38 }
 0x1c2   : > { %v1538_v32 = vsel %vm542_vm0, %v1537_v52, %v3247_v12  ;;  %v1284_v2 = vpop.permute.xlu2 %1283  ;;  %v1611_v3 = vrot.slane %v1568_v37, 4 }
 0x1c3   : > { %v1585_v23 = vrot.slane %v3254_v22, 4  ;;  %v1544_v43 = vperm.slane %v1538_v32, %v2487_v60  ;;  %v1277_v0 = vpop.permute.xlu1 %1276  ;;  %v3262_v53 = vadd.f32 %v1284_v2, %v3763_v25  ;;  %v3770_v25 = vld [vmem:[#allocation21_spill] sm:$0xff] }
 0x1c4   : > { %v3279_v26 = vadd.f32 %v1277_v0, %v3765_v41 }
 0x1c5   : > { %v1270_v55 = vpop.permute.xlu0 %1269  ;;  %v1586_v13 = vsel %vm542_vm0, %v1585_v23, %v1544_v43  ;;  %v1637_v59 = vrot.slane %v3262_v53, 4  ;;  %v3769_v23 = vld [vmem:[#allocation24_spill] sm:$0xff] }
 0x1c6   : > { %v1592_v8 = vperm.slane %v1586_v13, %v2531_v24  ;;  %v3275_v48 = vadd.f32 %v1270_v55, %v3764_v57  ;;  %v1625_v27 = vrot.slane %v3279_v26, 4 }
 0x1c8   : > { %v1612_v16 = vsel %vm542_vm0, %v1592_v8, %v1611_v3  ;;  %v1638_v15 = vsel %vm542_vm0, %v1637_v59, %v3275_v48  ;;  %v1609_v63 = vrot.slane %v1592_v8, 4  ;;  %v1626_v17 = vsel %vm542_vm0, %v1625_v27, %v3297_v21 }
 0x1c9   : > { %1855 = vrot.lane.b32.xlu1 %v1612_v16, %s2272_s7  ;;  %v3291_v39 = vperm.slane %v1638_v15, %v2487_v60  ;;  %v3310_v2 = vperm.slane %v1626_v17, %v2487_v60  ;;  %v1587_v59 = vrot.slane %v1544_v43, 4 }
 0x1ca   : > { %v1305_v34 = vpop.permute.xlu2 %1304  ;;  %v3304_v49 = vsel %vm542_vm0, %v1609_v63, %v1568_v37  ;;  %v3771_v37 = vld [vmem:[#allocation23_spill] sm:$0xff]  ;;  %v3773_v63 = vld [vmem:[#allocation28_spill] sm:$0xff] }
 0x1cb   : > { %v1298_v10 = vpop.permute.xlu1 %1297  ;;  %v3301_v5 = vadd.f32 %v1305_v34, %v3768_v18  ;;  %v1673_v28 = vrot.slane %v3291_v39, 4  ;;  %v1588_v17 = vsel %vm542_vm0, %v3254_v22, %v1587_v59 }
 0x1cc   : > { %v3320_v13 = vadd.f32 %v1298_v10, %v3771_v37  ;;  %v3772_v10 = vld [vmem:[#allocation27_spill] sm:$0xff]  ;;  %v3358_v22 = vperm.slane %v1588_v17, %v2531_v24 }
 0x1cd   : > { %v1291_v30 = vpop.permute.xlu0 %1290  ;;  %v1649_v35 = vrot.slane %v3301_v5, 4  ;;  %v1674_v8 = vsel %vm542_vm0, %v1673_v28, %v3310_v2  ;;  %v3775_v28 = vld [vmem:[#allocation25_spill] sm:$0xff] }
 0x1ce   : > { %v3314_v0 = vadd.f32 %v1291_v30, %v3769_v23  ;;  %v1680_v41 = vperm.slane %v1674_v8, %v2531_v24 }
 0x1d0   : > { %v1650_v3 = vsel %vm542_vm0, %v1649_v35, %v3314_v0  ;;  %v1723_v18 = vrot.slane %v1680_v41, 4 }
 0x1d1   : > { %1869 = vrot.lane.b32.xlu1 %v1502_v40, %s2273_s20  ;;  %v1656_v51 = vperm.slane %v1650_v3, %v2487_v60 }
 0x1d2   : > { %v1326_v1 = vpop.permute.xlu2 %1325 }
 0x1d3   : > { %v1319_v52 = vpop.permute.xlu1 %1318  ;;  %v3336_v27 = vadd.f32 %v1326_v1, %v3773_v63 }
 0x1d5   : > { %v1312_v32 = vpop.permute.xlu0 %1311 }
 0x1d6   : > { %v3317_v55 = vadd.f32 %v1312_v32, %v3770_v25  ;;  %v3776_v32 = vperm.slane %v3775_v28, 0 }
 0x1d8   : > { %v1661_v20 = vrot.slane %v3317_v55, 4  ;;  %v3347_v35 = vadd.f32 %v1319_v52, %v3776_v32  ;;  %v1563_v52 = vrot.slane %v3234_v9, 4  ;;  %v1503_v32 = vrot.slane %v3287_v31, 4 }
 0x1d9   : > { %v1699_v31 = vrot.slane %v1656_v51, 4 }
 0x1da   : > { %v1662_v6 = vsel %vm542_vm0, %v1661_v20, %v3320_v13  ;;  %v1347_v16 = vpop.permute.xlu2 %1346  ;;  %v1564_v9 = vsel %vm542_vm0, %v3228_v46, %v1563_v52 }
 0x1db   : > { %v1668_v57 = vperm.slane %v1662_v6, %v2487_v60  ;;  %v1340_v34 = vpop.permute.xlu1 %1339 }
 0x1dc   : > { %v3332_v61 = vadd.f32 %v1340_v34, %v3772_v10 }
 0x1dd   : > { %v1697_v15 = vrot.slane %v1668_v57, 4  ;;  %v1333_v30 = vpop.permute.xlu0 %1332 }
 0x1de   : > { %v1749_v40 = vrot.slane %v3332_v61, 4  ;;  %v3340_v38 = vadd.f32 %v1333_v30, %v3774_v62  ;;  %v1551_v30 = vrot.slane %v3238_v4, 4  ;;  %v3374_v62 = vadd.f32 %v1347_v16, %v2821_v56 }
 0x1df   : > { %v1698_v43 = vsel %vm542_vm0, %v1697_v15, %v1656_v51  ;;  %v1700_v51 = vsel %vm542_vm0, %v1668_v57, %v1699_v31  ;;  %v1515_v57 = vrot.slane %v3208_v36, 4  ;;  %v1504_v36 = vsel %vm542_vm0, %v3271_v7, %v1503_v32 }
 0x1e0   : > { %v1750_v23 = vsel %vm542_vm0, %v1749_v40, %v3336_v27  ;;  %v1737_v1 = vrot.slane %v3340_v38, 4  ;;  %v1704_v25 = vperm.slane %v1698_v43, %v2531_v24  ;;  %v1552_v4 = vsel %vm542_vm0, %v3231_v14, %v1551_v30 }
 0x1e1   : > { %v1756_v37 = vperm.slane %v1750_v23, %v2487_v60  ;;  %v3391_v23 = vperm.slane %v1564_v9, %v2531_v24  ;;  %v3401_v52 = vperm.slane %v1552_v4, %v2487_v60  ;;  %v1516_v32 = vsel %vm542_vm0, %v3191_v19, %v1515_v57 }
 0x1e2   : > { %v1738_v20 = vsel %vm542_vm0, %v1737_v1, %v3347_v35  ;;  %v1724_v8 = vsel %vm542_vm0, %v1704_v25, %v1723_v18  ;;  %v1368_v3 = vpop.permute.xlu2 %1367  ;;  %v3777_v18 = vld [vmem:[#allocation29_spill] sm:$0xff]  ;;  %v1721_v46 = vrot.slane %v1704_v25, 4  ;;  %v1539_v1 = vrot.slane %v3247_v12, 4 }
 0x1e3   : > { %v1785_v6 = vrot.slane %v1756_v37, 4  ;;  %v1744_v59 = vperm.slane %v1738_v20, %v2487_v60  ;;  %v1361_v34 = vpop.permute.xlu1 %1360  ;;  %1857 = vrot.lane.b32.xlu2 %v1724_v8, %s2272_s7  ;;  %v3364_v10 = vadd.f32 %v1368_v3, %v2809_v47  ;;  %v1613_v47 = vrot.slane %v3358_v22, 4 }
 0x1e4   : > { %v3367_v15 = vadd.f32 %v1361_v34, %v2813_v50  ;;  %v1527_v50 = vrot.slane %v3220_v44, 4  ;;  %v1663_v8 = vrot.slane %v3320_v13, 4  ;;  %v1639_v34 = vrot.slane %v3275_v48, 4 }
 0x1e5   : > { %v1773_v63 = vrot.slane %v3364_v10, 4  ;;  %v1354_v40 = vpop.permute.xlu0 %1353  ;;  %v1786_v28 = vsel %vm542_vm0, %v1785_v6, %v1744_v59  ;;  %v1787_v44 = vrot.slane %v1744_v59, 4  ;;  %v1614_v3 = vsel %vm542_vm0, %v1613_v47, %v3391_v23 }
 0x1e6   : > { %v1761_v43 = vrot.slane %v3367_v15, 4  ;;  %v3378_v17 = vadd.f32 %v1354_v40, %v3777_v18  ;;  %v1792_v25 = vperm.slane %v1786_v28, %v2531_v24  ;;  %v1540_v6 = vsel %vm542_vm0, %v3242_v58, %v1539_v1 }
 0x1e7   : > { %v1664_v13 = vsel %vm542_vm0, %v3317_v55, %v1663_v8  ;;  %v3411_v30 = vsel %vm542_vm0, %v1721_v46, %v1680_v41  ;;  %v1788_v58 = vsel %vm542_vm0, %v1756_v37, %v1787_v44  ;;  %v1528_v41 = vsel %vm542_vm0, %v3211_v54, %v1527_v50 }
 0x1e8   : > { %v1762_v56 = vsel %vm542_vm0, %v1761_v43, %v3374_v62  ;;  %v1774_v16 = vsel %vm542_vm0, %v1773_v63, %v3378_v17  ;;  %v1675_v63 = vrot.slane %v3310_v2, 4  ;;  %v1651_v43 = vrot.slane %v3314_v0, 4 }
 0x1e9   : > { %v1768_v20 = vperm.slane %v1762_v56, %v2487_v60  ;;  %v1780_v14 = vperm.slane %v1774_v16, %v2487_v60  ;;  %v1835_v18 = vrot.slane %v1792_v25, 4  ;;  %v3424_v2 = vperm.slane %v1664_v13, %v2487_v60 }
 0x1ea   : > { %v1708_v47 = vperm.slane %v1700_v51, %v2531_v24  ;;  %v1796_v0 = vperm.slane %v1788_v58, %v2531_v24  ;;  %v1597_v56 = vrot.slane %v3401_v52, 4  ;;  %v3431_v46 = vperm.slane %v1540_v6, %v2487_v60 }
 0x1eb   : > { %v1811_v12 = vrot.slane %v1768_v20, 4  ;;  %v1809_v59 = vrot.slane %v1780_v14, 4  ;;  %1871 = vrot.lane.b32.xlu2 %v1614_v3, %s2273_s20  ;;  %v1676_v54 = vsel %vm542_vm0, %v3291_v39, %v1675_v63  ;;  %v1640_v50 = vsel %vm542_vm0, %v3262_v53, %v1639_v34 }
 0x1ec   : > { %v1652_v16 = vsel %vm542_vm0, %v3301_v5, %v1651_v43  ;;  %v1684_v7 = vperm.slane %v1676_v54, %v2531_v24  ;;  %v1725_v53 = vrot.slane %v1708_v47, 4  ;;  %v3454_v39 = vperm.slane %v1640_v50, %v2487_v60 }
 0x1ed   : > { %v1810_v40 = vsel %vm542_vm0, %v1809_v59, %v1768_v20  ;;  %v1812_v9 = vsel %vm542_vm0, %v1780_v14, %v1811_v12  ;;  %v3447_v20 = vperm.slane %v1528_v41, %v2487_v60  ;;  %v1709_v14 = vrot.slane %v3424_v2, 4 }
 0x1ee   : > { %v1816_v48 = vperm.slane %v1810_v40, %v2531_v24  ;;  %v1820_v55 = vperm.slane %v1812_v9, %v2531_v24  ;;  %v1660_v5 = vperm.slane %v1652_v16, %v2487_v60  ;;  %v1627_v8 = vrot.slane %v3297_v21, 4 }
 0x1ef   : > { %v1775_v31 = vrot.slane %v3378_v17, 4  ;;  %v1598_v3 = vsel %vm542_vm0, %v1597_v56, %v3431_v46  ;;  %v1726_v59 = vsel %vm542_vm0, %v1725_v53, %v1684_v7  ;;  %v1839_v34 = vrot.slane %v1796_v0, 4 }
 0x1f0   : > { %v1836_v37 = vsel %vm542_vm0, %v1816_v48, %v1835_v18  ;;  %v1833_v4 = vrot.slane %v1816_v48, 4  ;;  %v1837_v28 = vrot.slane %v1820_v55, 4  ;;  %v1710_v6 = vsel %vm542_vm0, %v1709_v14, %v1660_v5 }
 0x1f1   : > { %1859 = vrot.lane.b32.xlu0 %v1836_v37, %s2272_s7  ;;  %v1628_v12 = vsel %vm542_vm0, %v3279_v26, %v1627_v8  ;;  %v1727_v13 = vrot.slane %v1684_v7, 4  ;;  %v3469_v19 = vperm.slane %v1516_v32, %v2487_v60  ;;  %v1685_v21 = vrot.slane %v3454_v39, 4 }
 0x1f2   : > { %v1838_v1 = vsel %vm542_vm0, %v1837_v28, %v1796_v0  ;;  %v3444_v44 = vsel %vm542_vm0, %v1833_v4, %v1792_v25  ;;  %v1573_v25 = vrot.slane %v3447_v20, 4  ;;  %v1604_v17 = vperm.slane %v1598_v3, %v2531_v24 }
 0x1f3   : > { %1885 = vrot.lane.b32.xlu2 %v1504_v36, %s2274_s23  ;;  %1875 = vrot.lane.b32.xlu1 %v1838_v1, %s2273_s20  ;;  %v1776_v51 = vsel %vm542_vm0, %v3364_v10, %v1775_v31  ;;  %v1840_v63 = vsel %vm542_vm0, %v1820_v55, %v1839_v34  ;;  %v1728_v26 = vsel %vm542_vm0, %v1708_v47, %v1727_v13  ;;  %v1751_v9 = vrot.slane %v3336_v27, 4 }
 0x1f4   : > { %v1716_v40 = vperm.slane %v1710_v6, %v2531_v24  ;;  %v1636_v58 = vperm.slane %v1628_v12, %v2487_v60  ;;  %v1574_v43 = vsel %vm542_vm0, %v1573_v25, %v3469_v19  ;;  %v1784_v48 = vperm.slane %v1776_v51, %v2487_v60 }
 0x1f5   : > { %v1615_v10 = vrot.slane %v3391_v23, 4  ;;  %v1752_v55 = vsel %vm542_vm0, %v3332_v61, %v1751_v9  ;;  %v1763_v57 = vrot.slane %v3374_v62, 4  ;;  %v1617_v47 = vrot.slane %v1604_v17, 4 }
 0x1f6   : > { %v1686_v18 = vsel %vm542_vm0, %v1685_v21, %v1636_v58  ;;  %v1729_v41 = vrot.slane %v1716_v40, 4  ;;  %v1580_v37 = vperm.slane %v1574_v43, %v2531_v24  ;;  %v1739_v27 = vrot.slane %v3347_v35, 4 }
 0x1f7   : > { %v1764_v4 = vsel %vm542_vm0, %v3367_v15, %v1763_v57  ;;  %v1616_v0 = vsel %vm542_vm0, %v3358_v22, %v1615_v10  ;;  %v1692_v23 = vperm.slane %v1686_v18, %v2531_v24  ;;  %v1760_v28 = vperm.slane %v1752_v55, %v2487_v60 }
 0x1f8   : > { %v1821_v56 = vrot.slane %v1784_v48, 4  ;;  %v1740_v61 = vsel %vm542_vm0, %v3340_v38, %v1739_v27  ;;  %v1618_v35 = vsel %vm542_vm0, %v1617_v47, %v1580_v37  ;;  %v1772_v36 = vperm.slane %v1764_v4, %v2487_v60 }
 0x1f9   : > { %1873 = vrot.lane.b32.xlu0 %v1726_v59, %s2273_s20  ;;  %v1730_v62 = vsel %vm542_vm0, %v1729_v41, %v1692_v23  ;;  %v1797_v22 = vrot.slane %v1760_v28, 4  ;;  %v1748_v15 = vperm.slane %v1740_v61, %v2487_v60  ;;  %v1619_v50 = vrot.slane %v1580_v37, 4 }
 0x1fa   : > { %v1822_v54 = vsel %vm542_vm0, %v1821_v56, %v1772_v36  ;;  %v1711_v7 = vrot.slane %v1660_v5, 4  ;;  %v1823_v53 = vrot.slane %v1772_v36, 4  ;;  %v1599_v3 = vrot.slane %v3431_v46, 4 }
 0x1fb   : > { %1891 = vrot.lane.b32.xlu2 %v1840_v63, %s2274_s23  ;;  %1889 = vrot.lane.b32.xlu1 %v1728_v26, %s2274_s23  ;;  %v1828_v16 = vperm.slane %v1822_v54, %v2531_v24  ;;  %v1798_v38 = vsel %vm542_vm0, %v1797_v22, %v1748_v15  ;;  %v1620_v1 = vsel %vm542_vm0, %v1604_v17, %v1619_v50  ;;  %v1799_v25 = vrot.slane %v1748_v15, 4 }
 0x1fc   : > { %v1804_v14 = vperm.slane %v1798_v38, %v2531_v24  ;;  %v1824_v32 = vsel %vm542_vm0, %v1784_v48, %v1823_v53  ;;  %v1712_v8 = vsel %vm542_vm0, %v3424_v2, %v1711_v7  ;;  %v1687_v12 = vrot.slane %v1636_v58, 4 }
 0x1fd   : > { %v1841_v60 = vrot.slane %v1828_v16, 4  ;;  %v1832_v6 = vperm.slane %v1824_v32, %v2531_v24  ;;  %v1720_v5 = vperm.slane %v1712_v8, %v2531_v24  ;;  %v1800_v2 = vsel %vm542_vm0, %v1760_v28, %v1799_v25 }
 0x1fe   : > { %v1843_v31 = vrot.slane %v1804_v14, 4  ;;  %v1688_v46 = vsel %vm542_vm0, %v3454_v39, %v1687_v12  ;;  %v1600_v59 = vsel %vm542_vm0, %v3401_v52, %v1599_v3  ;;  %v1731_v34 = vrot.slane %v1692_v23, 4 }
 0x1ff   : > { %v1845_v13 = vrot.slane %v1832_v6, 4  ;;  %v1733_v21 = vrot.slane %v1720_v5, 4  ;;  %v1575_v17 = vrot.slane %v3469_v19, 4  ;;  %v1808_v63 = vperm.slane %v1800_v2, %v2531_v24 }
 0x200   : > { %v1732_v51 = vsel %vm542_vm0, %v1716_v40, %v1731_v34  ;;  %v1608_v26 = vperm.slane %v1600_v59, %v2531_v24 }
 0x201   : > { %1887 = vrot.lane.b32.xlu0 %v1616_v0, %s2274_s23  ;;  %v1576_v39 = vsel %vm542_vm0, %v3447_v20, %v1575_v17  ;;  %v1846_v52 = vsel %vm542_vm0, %v1845_v13, %v1808_v63  ;;  %v1847_v18 = vrot.slane %v1808_v63, 4  ;;  %s2008_s23 = scalar_lea.hbm %s3636_s2, %s2115_s16 }
 0x202   : > { %v1584_v19 = vperm.slane %v1576_v39, %v2531_v24  ;;  %v1621_v40 = vrot.slane %v1608_v26, 4  ;;  %s2011_s12 = sshll.u32 %s2008_s23, 4  ;;  %s2012_s12 = int_to_ptr.hbm [resolvable:$true] %s2011_s12 }
 0x203   : > { %1905 = vrot.lane.b32.xlu2 %v1730_v62, %s2275_s24  ;;  %1903 = vrot.lane.b32.xlu1 %v1618_v35, %s2275_s24 }
 0x204   : > { %v1622_v9 = vsel %vm542_vm0, %v1621_v40, %v1584_v19  ;;  %v1623_v48 = vrot.slane %v1584_v19, 4 }
 0x206   : > { %v1624_v20 = vsel %vm542_vm0, %v1608_v26, %v1623_v48 }
 0x209   : > { %1901 = vrot.lane.b32.xlu0 %v3214_v42, %s2275_s24  ;;  %v1842_v42 = vsel %vm542_vm0, %v1841_v60, %v1804_v14 }
 0x20b   : > { %1919 = vrot.lane.b32.xlu2 %v1620_v1, %s2276_s25  ;;  %1917 = vrot.lane.b32.xlu1 %v3200_v45, %s2276_s25  ;;  %v1844_v45 = vsel %vm542_vm0, %v1828_v16, %v1843_v31 }
 0x211   : > { %1907 = vrot.lane.b32.xlu0 %v1842_v42, %s2275_s24  ;;  %s2009_s24 = sshll.u32 %s3110_s15, 4  ;;  %s2010_s24 = int_to_ptr.vmem [resolvable:$true] %s2009_s24 }
 0x213   : > { %1933 = vrot.lane.b32.xlu2 %v3217_v11, %s2277_s26  ;;  %1923 = vrot.lane.b32.xlu1 %v1844_v45, %s2276_s25  ;;  %v1696_v11 = vperm.slane %v1688_v46, %v2531_v24  ;;  %v1848_v24 = vsel %vm542_vm0, %v1832_v6, %v1847_v18 }
 0x215   : > { %v1734_v58 = vsel %vm542_vm0, %v1733_v21, %v1696_v11  ;;  %v1735_v43 = vrot.slane %v1696_v11, 4 }
 0x217   : > { %v1736_v10 = vsel %vm542_vm0, %v1720_v5, %v1735_v43 }
 0x219   : > { %1921 = vrot.lane.b32.xlu0 %v1732_v51, %s2276_s25  ;;  %s1994_s25 = scalar_lea.sflag [#allocation3], %s165_s4 }
 0x21b   : > { %1939 = vrot.lane.b32.xlu2 %v1846_v52, %s2277_s26  ;;  %1937 = vrot.lane.b32.xlu1 %v1734_v58, %s2277_s26 }
 0x221   : > { %1935 = vrot.lane.b32.xlu0 %v1622_v9, %s2277_s26  ;;  %s2204_s26 = sshra.s32 %s2012_s12, 4  ;;  %s2205_s26 = int_to_ptr.hbm [resolvable:$true] %s2204_s26 }
 0x222   : > { %p2211_p0 = scmp.lt.s32.totalorder %s2205_s26, %s3636_s2 }
 0x223   : > { %1953 = vrot.lane.b32.xlu2 %v1736_v10, %s2278_s27  ;;  %1951 = vrot.lane.b32.xlu1 %v1624_v20, %s2278_s27  ;;  %v1854_v37 = vpop.permute.xlu0 %1853 }
 0x229   : > { %1949 = vrot.lane.b32.xlu0 %v3204_v29, %s2278_s27 }
 0x231   : > { %1955 = vrot.lane.b32.xlu0 %v1848_v24, %s2278_s27  ;;  %s2206_s27 = scalar_lea.hbm %s2205_s26, 64 }
 0x232   : > { %p2207_p11 = scmp.ne.s32.totalorder %s2205_s26, %s2206_s27  ;;  %p2212_p1 = scmp.lt.s32.totalorder %s2210_s30, %s2206_s27 }
 0x234   : > { %p2208_p12 = pnand %p2207_p11, %p2335_p4  ;;  %p2213_p2 = por %p2212_p1, %p2211_p0 }
 0x236   : > { %p2209_p13 = pneg %p2208_p12 }
 0x238   : > { %p2214_p3 = pnand %p2213_p2, %p2209_p13 }
 0x23b   : > { %v1856_v47 = vpop.permute.xlu1 %1855 }
 0x23c   : > { %v1962_v60 = vsel %vm1102_vm1, %v3304_v49, %v1856_v47  ;;  %v1961_v49 = vsel %vm1102_vm1, %v3197_v33, %v1854_v37 }
 0x23d   : > { %v1858_v55 = vpop.permute.xlu2 %1857 }
 0x23e   : > { %v1963_v50 = vsel %vm1102_vm1, %v3411_v30, %v1858_v55 }
 0x243   : > { %v1870_v4 = vpop.permute.xlu1 %1869 }
 0x244   : > { %v1965_v6 = vsel %vm1107_vm2, %v1961_v49, %v1870_v4 }
 0x245   : > { %v1872_v57 = vpop.permute.xlu2 %1871 }
 0x246   : > { %v1966_v32 = vsel %vm1107_vm2, %v1962_v60, %v1872_v57 }
 0x24d   : > { %v1886_v41 = vpop.permute.xlu2 %1885 }
 0x24e   : > { %v1969_v2 = vsel %vm1112_vm3, %v1965_v6, %v1886_v41 }
 0x255   : > { %v1892_v27 = vpop.permute.xlu2 %1891 }
 0x25d   : > { %v1906_v28 = vpop.permute.xlu2 %1905 }
 0x263   : > { %v1860_v0 = vpop.permute.xlu0 %1859 }
 0x264   : > { %v1964_v13 = vsel %vm1102_vm1, %v3444_v44, %v1860_v0 }
 0x265   : > { %v1876_v23 = vpop.permute.xlu1 %1875  ;;  %v1920_v62 = vpop.permute.xlu2 %1919 }
 0x266   : > { %v1968_v17 = vsel %vm1107_vm2, %v1964_v13, %v1876_v23 }
 0x267   : > { %v1972_v11 = vsel %vm1112_vm3, %v1968_v17, %v1892_v27 }
 0x26b   : > { %v1874_v56 = vpop.permute.xlu0 %1873 }
 0x26c   : > { %v1967_v38 = vsel %vm1107_vm2, %v1963_v50, %v1874_v56 }
 0x26d   : > { %v1890_v61 = vpop.permute.xlu1 %1889  ;;  %v1934_v36 = vpop.permute.xlu2 %1933 }
 0x26e   : > { %v1971_v14 = vsel %vm1112_vm3, %v1967_v38, %v1890_v61 }
 0x26f   : > { %v1975_v53 = vsel %vm1117_vm4, %v1971_v14, %v1906_v28 }
 0x273   : > { %v1888_v35 = vpop.permute.xlu0 %1887 }
 0x274   : > { %v1970_v42 = vsel %vm1112_vm3, %v1966_v32, %v1888_v35 }
 0x275   : > { %v1904_v29 = vpop.permute.xlu1 %1903  ;;  %v1940_v16 = vpop.permute.xlu2 %1939 }
 0x276   : > { %v1974_v45 = vsel %vm1117_vm4, %v1970_v42, %v1904_v29 }
 0x277   : > { %v1978_v12 = vsel %vm1122_vm5, %v1974_v45, %v1920_v62 }
 0x27b   : > { %v1902_v22 = vpop.permute.xlu0 %1901 }
 0x27c   : > { %v1973_v59 = vsel %vm1117_vm4, %v1969_v2, %v1902_v22 }
 0x27d   : > { %v1918_v15 = vpop.permute.xlu1 %1917  ;;  %v1954_v31 = vpop.permute.xlu2 %1953 }
 0x27e   : > { %v1977_v33 = vsel %vm1122_vm5, %v1973_v59, %v1918_v15 }
 0x27f   : > { %v1981_v63 = vsel %vm1127_vm7, %v1977_v33, %v1934_v36 }
 0x283   : > { %v1908_v54 = vpop.permute.xlu0 %1907 }
 0x284   : > { %v1976_v39 = vsel %vm1117_vm4, %v1972_v11, %v1908_v54 }
 0x285   : > { %v1924_v1 = vpop.permute.xlu1 %1923 }
 0x286   : > { %v1980_v44 = vsel %vm1122_vm5, %v1976_v39, %v1924_v1 }
 0x287   : > { %v1984_v58 = vsel %vm1127_vm7, %v1980_v44, %v1940_v16 }
 0x28b   : > { %v1922_v7 = vpop.permute.xlu0 %1921 }
 0x28c   : > { %v1979_v8 = vsel %vm1122_vm5, %v1975_v53, %v1922_v7 }
 0x28d   : > { %v1938_v30 = vpop.permute.xlu1 %1937 }
 0x28e   : > { %v1983_v3 = vsel %vm1127_vm7, %v1979_v8, %v1938_v30 }
 0x28f   : > { %v1987_v25 = vsel %vm1132_vm6, %v1983_v3, %v1954_v31 }
 0x290   : > { %1991 = vst [vmem:[%s3110_s15 + $0x28] sm:$0xff] %v1987_v25 }
 0x293   : > { %v1936_v5 = vpop.permute.xlu0 %1935 }
 0x294   : > { %v1982_v46 = vsel %vm1127_vm7, %v1978_v12, %v1936_v5 }
 0x295   : > { %v1952_v34 = vpop.permute.xlu1 %1951 }
 0x296   : > { %v1986_v21 = vsel %vm1132_vm6, %v1982_v46, %v1952_v34 }
 0x297   : > { %1990 = vst [vmem:[%s3110_s15 + $0x18] sm:$0xff] %v1986_v21 }
 0x29b   : > { %v1950_v51 = vpop.permute.xlu0 %1949 }
 0x29c   : > { %v1985_v26 = vsel %vm1132_vm6, %v1981_v63, %v1950_v51 }
 0x29d   : > { %1989 = vst [vmem:[%s3110_s15 + $0x8] sm:$0xff] %v1985_v26 }
 0x2a3   : > { %v1956_v52 = vpop.permute.xlu0 %1955 }
 0x2a4   : > { %v1988_v19 = vsel %vm1132_vm6, %v1984_v58, %v1956_v52 }
 0x2a5   : > { %1992 = vst [vmem:[%s3110_s15 + $0x38] sm:$0xff] %v1988_v19 }
 0x2a6   : > { %2217 = shalt.err (!%p2214_p3)
}
 0x2a7   : > { %s2279_s4 = smov 256  }
 0x2a8   : > { %2116 = dma.vmem_to_hbm [thread:$0]  (%p2335_p4), %s2010_s24, 1024, %s2012_s12, %s1994_s25, %s2279_s4, %s2279_s4, %s2272_s7  }
 0x2a9 PF: > { %p2122_p5 = scmp.ge.s32.totalorder %s2268_s14, 2  ;;  %s2026_s6 = sand.u32 1, %s2248_s9  }
 0x2aa   : > { %s2027_s8 = scalar_lea.sflag [#allocation3], %s2026_s6 }
 0x2ab   : > { %p2119_p6 = pnand %p2122_p5, %p2342_p8 }
 0x2ad   : > { %p2120_p7 = pneg %p2119_p6 }
 0x2af   : > { %2243 = dma.done.wait (%p2120_p7), %s2027_s8, 1024  }
 0x2b0   : > { %2245 = vsyncadd (%p2120_p7), %s2027_s8, 4294966272  ;;  %s15_s14 = sadd.s32 1, %s2268_s14   ;;  %s3778_s9 = smov %s2252_s10 }
 0x2b1   : > { %p12_p9 = scmp.ge.s32.totalorder %s15_s14, 4   ;;  %s3779_s10 = smov %s2256_s11 }
 0x2b2   : > { %s3780_s11 = smov %s2348_s22  ;;  %s3781_s12 = smov %s2264_s13 }
 0x2b3   : > { %s3782_s13 = smov %s3784_s17  ;;  %14 = sbr.rel (!%p12_p9) target bundleno = 4 (0x4), region = 66 }
 0x2b8   :  { %2033 = vsyncpa [#allocation3], 1 }
 0x2b9   :  { %2035 = vsyncpa [#allocation3 + $0x1], 1 }

</bundles_post_ra>
